<compile_context>
chip_gen: v7x
topology: tpu7x:2x2x1
jax: 0.10.0
libtpu: 0.0.40
codegen_flags: <defaults>
</compile_context>

<pallas_src>
import math

import jax
import jax.numpy as jnp
import numpy as np
from jax.experimental import pallas as pl
from jax.experimental.pallas import tpu as pltpu


# ----------------------------- config (small, deterministic) -----------------------------
B = 2            # batch
N = 4            # number of nodes
SEQ_LEN = 8      # config.seq_len
PRED_LEN = 4     # config.pred_len
D_MODEL = 32     # config.d_model
D_FF = 16        # config.d_ff
D_LLM = 64       # stand-in for GPT2 hidden (768) at small scale
N_HEADS = 2
D_KEYS = D_FF    # d_keys = config.d_ff in the module
HE = N_HEADS * D_KEYS          # 32
VOCAB = 128      # stand-in vocab size
NUM_TOKENS = 32  # stand-in for self.num_tokens (=100 in the module)
PT = 4           # #temporal patches from TFormer
PS = 3           # #spatial patches from SFormer
LONG_LEN = 24    # long-term history length (>= SEQ_LEN)

TM = 16          # query-row tile -> grid=(2,), lets v7x's second TensorCore take half the rows


# ----------------------------- fused mapping + dual-QFormer kernel -----------------------------
def _st4llm_align_kernel(tgt_ref, word_ref, mapw_ref, mapb_ref,
                         wq_ref, bq_ref, wkv_ref, bkv_ref, wo_ref, bo_ref, o_ref):
    """One grid step = one query-row tile of BOTH QFormer problems (0=temporal, 1=spatial).

    tgt : (2, TM, d_model)         query rows for this tile (problem axis leading)
    word: (VOCAB, d_llm)           word-embedding table (shared)
    mapw: (2, num_tokens, VOCAB)   mapping_{t,s}_layer weights;  mapb: (2, num_tokens, 1) row bias
    wq  : (2, d_model, H*E)  pre-scaled by 1/sqrt(E);  bq: (2, 1, H*E) pre-scaled
    wkv : (2, d_llm, 2*H*E)  K and V packed along columns;  bkv: (2, 1, 2*H*E)
    wo  : (2, H*E, d_llm);   bo: (2, 1, d_llm)
    o   : (TM, 2*d_llm)            lane-dense 128-wide output slab (t in left half, s in right)
    """
    f32 = jnp.float32
    word = word_ref[...]                                   # (VOCAB, d_llm)
    halves = []
    for p in range(2):                                     # static: 0 = temporal, 1 = spatial
        # mapping_{t,s}_layer: src = W_map @ word_emb + b  (ROW bias), computed in-kernel so the
        # (num_tokens, d_llm) slab never round-trips HBM between "calls".
        src = jnp.dot(mapw_ref[p], word, preferred_element_type=f32) + mapb_ref[p]      # (S, d_llm)
        # Packed K/V projection: one MXU push covers both K and V for all heads.
        kv = jnp.dot(src, wkv_ref[p], preferred_element_type=f32) + bkv_ref[p]          # (S, 2*H*E)
        k = kv[:, :HE]
        v = kv[:, HE:]
        # Packed Q projection for this row tile (1/sqrt(d_keys) already folded into wq/bq).
        q = jnp.dot(tgt_ref[p], wq_ref[p], preferred_element_type=f32) + bq_ref[p]      # (TM, H*E)

        wo_p = wo_ref[p]                                   # (H*E, d_llm)
        out_p = bo_ref[p]                                  # (1, d_llm) -> broadcasts
        for h in range(N_HEADS):                           # static; heads = lane slices of packed q/k/v
            sl = slice(h * D_KEYS, (h + 1) * D_KEYS)
            s = jnp.einsum('me,se->ms', q[:, sl], k[:, sl],
                           preferred_element_type=f32)     # (TM, S)
            m = jnp.max(s, axis=-1, keepdims=True)
            e = jnp.exp(s - m)
            a = e * pl.reciprocal(jnp.sum(e, axis=-1, keepdims=True), approx=True)
            # TODO(synk): attention dropout (p=0.1) skipped -> inference / eval semantics.
            rep = jnp.dot(a, v[:, sl], preferred_element_type=f32)                       # (TM, E)
            # concat over heads folded into a per-head sum on row slices of wo.
            out_p = out_p + jnp.dot(rep, wo_p[sl, :], preferred_element_type=f32)        # (TM, d_llm)
        halves.append(out_p)
    # Lane-dense (TM, 2*d_llm = 128) store: unmasked vst instead of two 64-wide partials.
    o_ref[...] = jnp.concatenate(halves, axis=-1).astype(o_ref.dtype)


def st4llm_align(kp, tgt_all):
    """tgt_all: (2, M_pad, d_model) query rows (problem axis leading, rows padded to a TM multiple)
    -> (M_pad, 2*d_llm) slab: temporal result in [:, :d_llm], spatial in [:, d_llm:]."""
    _, m_pad, dm = tgt_all.shape
    assert m_pad % TM == 0
    grid = (m_pad // TM,)
    return pl.pallas_call(
        _st4llm_align_kernel,
        out_shape=jax.ShapeDtypeStruct((m_pad, 2 * D_LLM), jnp.float32),
        grid=grid,
        in_specs=[
            pl.BlockSpec((2, TM, dm), lambda i: (0, i, 0)),
            pl.BlockSpec((VOCAB, D_LLM), lambda i: (0, 0)),
            pl.BlockSpec((2, NUM_TOKENS, VOCAB), lambda i: (0, 0, 0)),
            pl.BlockSpec((2, NUM_TOKENS, 1), lambda i: (0, 0, 0)),
            pl.BlockSpec((2, D_MODEL, HE), lambda i: (0, 0, 0)),
            pl.BlockSpec((2, 1, HE), lambda i: (0, 0, 0)),
            pl.BlockSpec((2, D_LLM, 2 * HE), lambda i: (0, 0, 0)),
            pl.BlockSpec((2, 1, 2 * HE), lambda i: (0, 0, 0)),
            pl.BlockSpec((2, HE, D_LLM), lambda i: (0, 0, 0)),
            pl.BlockSpec((2, 1, D_LLM), lambda i: (0, 0, 0)),
        ],
        out_specs=pl.BlockSpec((TM, 2 * D_LLM), lambda i: (i, 0)),
        compiler_params=pltpu.CompilerParams(dimension_semantics=("parallel",)),
    )(tgt_all, kp["word_emb"], kp["map_w"], kp["map_b"],
      kp["wq"], kp["bq"], kp["wkv"], kp["bkv"], kp["wo"], kp["bo"])


# ----------------------------- pure-JAX references (for self-test) -----------------------------
def qformer_ref(cp, target, source):
    """Mirrors QFormerST.forward (eval mode) in the ORIGINAL torch layout with the explicit
    1/sqrt(d_keys) scale (i.e. before the scale is folded into wq/bq)."""
    BB, L, _ = target.shape
    S = source.shape[0]
    q = (target @ cp["wq"] + cp["bq"]).reshape(BB, L, N_HEADS, D_KEYS)
    k = (source @ cp["wk"] + cp["bk"]).reshape(S, N_HEADS, D_KEYS)
    v = (source @ cp["wv"] + cp["bv"]).reshape(S, N_HEADS, D_KEYS)
    scores = jnp.einsum("blhe,she->bhls", q, k) / math.sqrt(D_KEYS)
    A = jax.nn.softmax(scores, axis=-1)
    rep = jnp.einsum("bhls,she->blhe", A, v).reshape(BB, L, HE)
    return rep @ cp["wo"] + cp["bo"]


def mapping_ref(w, b, word_emb):
    # source_embedding = mapping(word_emb.T).T  ==  W @ word_emb + b[:, None]  (row bias)
    return w @ word_emb + b[:, None]


# ----------------------------- parameter packing / init -----------------------------
def pack_kernel_params(word_emb, map_t, map_s, canon_t, canon_s):
    """Canonical torch-layout params -> fused-kernel layout: problem axis leading, K/V packed
    along columns, 1/sqrt(d_keys) folded into the query projection."""
    scale = 1.0 / math.sqrt(D_KEYS)

    def pack_one(c):
        return dict(
            wq=c["wq"] * scale,
            bq=(c["bq"] * scale)[None, :],                           # (1, H*E)
            wkv=jnp.concatenate([c["wk"], c["wv"]], axis=1),         # (d_llm, 2*H*E)
            bkv=jnp.concatenate([c["bk"], c["bv"]])[None, :],        # (1, 2*H*E)
            wo=c["wo"],                                              # (H*E, d_llm), head-major rows
            bo=c["bo"][None, :],                                     # (1, d_llm)
        )

    t, s = pack_one(canon_t), pack_one(canon_s)
    kp = {k: jnp.stack([t[k], s[k]], axis=0) for k in t}
    kp["word_emb"] = word_emb
    kp["map_w"] = jnp.stack([map_t[0], map_s[0]], axis=0)                      # (2, num_tokens, vocab)
    kp["map_b"] = jnp.stack([map_t[1], map_s[1]], axis=0)[..., None]           # (2, num_tokens, 1)
    return kp


def init_params(key):
    ks = iter(jax.random.split(key, 16))
    f32 = jnp.float32

    def lin(kin, kout, k):
        kw, kb = jax.random.split(k)
        w = jax.random.normal(kw, (kin, kout), f32) * (1.0 / math.sqrt(kin))
        b = jax.random.normal(kb, (kout,), f32) * 0.01
        return w, b

    def qformer_canon(k):
        k1, k2, k3, k4 = jax.random.split(k, 4)
        wq, bq = lin(D_MODEL, HE, k1)
        wk, bk = lin(D_LLM, HE, k2)
        wv, bv = lin(D_LLM, HE, k3)
        wo, bo = lin(HE, D_LLM, k4)
        return dict(wq=wq, bq=bq, wk=wk, bk=bk, wv=wv, bv=bv, wo=wo, bo=bo)

    p = {}
    # word embedding table (stand-in for the pretrained LLM embedding matrix)
    p["word_emb"] = jax.random.normal(next(ks), (VOCAB, D_LLM), f32) * 0.02
    # mapping_{t,s}_layer : Linear(vocab, num_tokens); torch weight layout (num_tokens, vocab)
    map_t_w = jax.random.normal(next(ks), (NUM_TOKENS, VOCAB), f32) * (1.0 / math.sqrt(VOCAB))
    map_s_w = jax.random.normal(next(ks), (NUM_TOKENS, VOCAB), f32) * (1.0 / math.sqrt(VOCAB))
    map_t_b = jax.random.normal(next(ks), (NUM_TOKENS,), f32) * 0.01
    map_s_b = jax.random.normal(next(ks), (NUM_TOKENS,), f32) * 0.01
    p["map_t"] = (map_t_w, map_t_b)
    p["map_s"] = (map_s_w, map_s_b)
    # aligning layers: canonical layout kept for the self-test reference; packed layout for kernel.
    p["align_t_canon"] = qformer_canon(next(ks))
    p["align_s_canon"] = qformer_canon(next(ks))
    p["kernel"] = pack_kernel_params(p["word_emb"], p["map_t"], p["map_s"],
                                     p["align_t_canon"], p["align_s_canon"])
    # output_projection Linear(2*d_ff, pred_len)
    p["out_w"], p["out_b"] = lin(2 * D_FF, PRED_LEN, next(ks))
    # TODO(synk): pretrained TFormer / SFormer encoders are external checkpoints; replaced by
    # deterministic synthetic extracted features of the correct shapes.
    p["extracted_t"] = jax.random.normal(next(ks), (B, N, PT, D_MODEL), jnp.float32)
    p["extracted_s"] = jax.random.normal(next(ks), (B, N, PS, D_MODEL), jnp.float32)
    # TODO(synk): tokenizer-built manual prompts + pretrained-LLM embedding lookup, and the
    # patch_transform Conv2d, are omitted: under the identity LLM-backbone stub their positions
    # in llm_inp_{t,s} are sliced away before the output projection (numerically dead compute).
    return p


# ----------------------------- ST4llm predict-mode forward -----------------------------
def st4llm_forward(p, long_history):
    Bh, _, Nh, _ = long_history.shape
    assert (Bh, Nh) == (B, N)
    # short_term_history only feeds the textual prompts / dead-code x_embed in the reference
    # forward; both are stubbed, so it is unused here.
    _short = long_history[:, -SEQ_LEN:]
    # TODO(synk): x_embed = enc_embedding(short_term_history) is dead code in the reference forward; skipped.

    # Query rows for the two QFormer problems (same reshapes as the torch module).
    ef_t = p["extracted_t"].reshape(B * N * PT, D_MODEL)                             # (32, d_model)
    ef_s = jnp.transpose(p["extracted_s"], (0, 2, 1, 3)).reshape(B * PS * N, D_MODEL)  # (24, d_model)
    m_t, m_s = ef_t.shape[0], ef_s.shape[0]
    m_pad = ((max(m_t, m_s) + TM - 1) // TM) * TM
    # Pad QUERY rows only (rows are independent in cross-attention); the key axis is never padded.
    tgt_all = jnp.stack([jnp.pad(ef_t, ((0, m_pad - m_t), (0, 0))),
                         jnp.pad(ef_s, ((0, m_pad - m_s), (0, 0)))], axis=0)         # (2, m_pad, d_model)

    # ONE fused Pallas call: mapping_{t,s}_layer + both QFormerST cross-attentions.
    slab = st4llm_align(p["kernel"], tgt_all)                                        # (m_pad, 2*d_llm)
    aligned_t = slab[:m_t, :D_LLM].reshape(B, N, PT, D_LLM)
    aligned_s = slab[:m_s, D_LLM:].reshape(B, PS, N, D_LLM)

    # TODO(synk): pretrained GPT2/Llama backbone (self.predict) has no Pallas equivalent; it is
    # modeled as identity followed by the reference's [..., :d_ff] slice.  Under that stub
    # dec_out_t keeps only the last temporal patch and dec_out_s keeps only the last N positions,
    # so the prompt embeddings and the patch_transform Conv2d output never reach the result.
    dec_t = aligned_t[:, :, -1, :D_FF]               # (B, N, d_ff)
    dec_s = aligned_s[:, -1, :, :D_FF]               # (B, N, d_ff)
    dec = jnp.concatenate([dec_t, dec_s], axis=-1)   # (B, N, 2*d_ff)

    # output_projection: tiny, lane-sparse (pred_len=4 << 128 lanes); plain JAX per perf review.
    out = dec @ p["out_w"] + p["out_b"]              # (B, N, pred_len)
    return jnp.transpose(out[..., None], (0, 2, 1, 3))   # (B, pred_len, N, 1)


if __name__ == "__main__":
    key = jax.random.PRNGKey(0)
    kp_key, kx = jax.random.split(key)
    params = init_params(kp_key)
    long_history = jax.random.normal(kx, (B, LONG_LEN, N, 3), jnp.float32)

    # --- self-test: fused kernel (packed projections, folded scale, approx reciprocal, padded
    #     spatial query rows) vs the canonical torch-layout reference with explicit scaling ---
    ef_t = params["extracted_t"].reshape(B * N * PT, D_MODEL)
    ef_s = jnp.transpose(params["extracted_s"], (0, 2, 1, 3)).reshape(B * PS * N, D_MODEL)
    m_t, m_s = ef_t.shape[0], ef_s.shape[0]
    m_pad = ((max(m_t, m_s) + TM - 1) // TM) * TM
    tgt_all = jnp.stack([jnp.pad(ef_t, ((0, m_pad - m_t), (0, 0))),
                         jnp.pad(ef_s, ((0, m_pad - m_s), (0, 0)))], axis=0)
    slab = st4llm_align(params["kernel"], tgt_all)

    src_t_ref = mapping_ref(params["map_t"][0], params["map_t"][1], params["word_emb"])
    src_s_ref = mapping_ref(params["map_s"][0], params["map_s"][1], params["word_emb"])
    want_t = qformer_ref(params["align_t_canon"], ef_t.reshape(B * N, PT, D_MODEL),
                         src_t_ref).reshape(m_t, D_LLM)
    want_s = qformer_ref(params["align_s_canon"], ef_s.reshape(B * PS, N, D_MODEL),
                         src_s_ref).reshape(m_s, D_LLM)
    np.testing.assert_allclose(np.asarray(slab[:m_t, :D_LLM]), np.asarray(want_t),
                               rtol=5e-3, atol=1e-3)
    np.testing.assert_allclose(np.asarray(slab[:m_s, D_LLM:]), np.asarray(want_s),
                               rtol=5e-3, atol=1e-3)

    # --- full predict-path forward ---
    fwd = jax.jit(st4llm_forward)
    out = jax.block_until_ready(fwd(params, long_history))
    assert out.shape == (B, PRED_LEN, N, 1)
    print("KERNEL_OK")
</pallas_src>

<mosaic_0001>
module attributes {stable_mosaic.version = 11 : i64} {
  func.func @_st4llm_align_kernel(%arg0: i32, %arg1: memref<2x16x32xf32, #tpu.memory_space<vmem>>, %arg2: memref<128x64xf32, #tpu.memory_space<vmem>>, %arg3: memref<2x32x128xf32, #tpu.memory_space<vmem>>, %arg4: memref<2x32x1xf32, #tpu.memory_space<vmem>>, %arg5: memref<2x32x32xf32, #tpu.memory_space<vmem>>, %arg6: memref<2x1x32xf32, #tpu.memory_space<vmem>>, %arg7: memref<2x64x64xf32, #tpu.memory_space<vmem>>, %arg8: memref<2x1x64xf32, #tpu.memory_space<vmem>>, %arg9: memref<2x32x64xf32, #tpu.memory_space<vmem>>, %arg10: memref<2x1x64xf32, #tpu.memory_space<vmem>>, %arg11: memref<16x128xf32, #tpu.memory_space<vmem>>) attributes {dimension_semantics = [#tpu.dimension_semantics<parallel>], iteration_bounds = array<i64: 2>, scalar_prefetch = 0 : i64, scratch_operands = 0 : i64, tpu.core_type = #tpu.core_type<tc>, window_params = [{transform_indices = @transform_0, window_bounds = array<i64: 2, 16, 32>}, {pipeline_mode = #tpu.pipeline_mode<synchronous>, transform_indices = @transform_1, window_bounds = array<i64: 128, 64>}, {pipeline_mode = #tpu.pipeline_mode<synchronous>, transform_indices = @transform_2, window_bounds = array<i64: 2, 32, 128>}, {pipeline_mode = #tpu.pipeline_mode<synchronous>, transform_indices = @transform_3, window_bounds = array<i64: 2, 32, 1>}, {pipeline_mode = #tpu.pipeline_mode<synchronous>, transform_indices = @transform_4, window_bounds = array<i64: 2, 32, 32>}, {pipeline_mode = #tpu.pipeline_mode<synchronous>, transform_indices = @transform_5, window_bounds = array<i64: 2, 1, 32>}, {pipeline_mode = #tpu.pipeline_mode<synchronous>, transform_indices = @transform_6, window_bounds = array<i64: 2, 64, 64>}, {pipeline_mode = #tpu.pipeline_mode<synchronous>, transform_indices = @transform_7, window_bounds = array<i64: 2, 1, 64>}, {pipeline_mode = #tpu.pipeline_mode<synchronous>, transform_indices = @transform_8, window_bounds = array<i64: 2, 32, 64>}, {pipeline_mode = #tpu.pipeline_mode<synchronous>, transform_indices = @transform_9, window_bounds = array<i64: 2, 1, 64>}, {transform_indices = @transform_10, window_bounds = array<i64: 16, 128>}]} {
    %c0 = arith.constant 0 : index
    %c0_0 = arith.constant 0 : index
    %0 = vector.load %arg2[%c0, %c0_0] : memref<128x64xf32, #tpu.memory_space<vmem>>, vector<128x64xf32>
    %c0_1 = arith.constant 0 : index
    %c0_2 = arith.constant 0 : index
    %c0_3 = arith.constant 0 : index
    %1 = vector.load %arg3[%c0_1, %c0_2, %c0_3] : memref<2x32x128xf32, #tpu.memory_space<vmem>>, vector<1x32x128xf32>
    %2 = vector.shape_cast %1 : vector<1x32x128xf32> to vector<32x128xf32>
    %cst = arith.constant dense<0.000000e+00> : vector<32x64xf32>
    %3 = tpu.matmul %2, %0, %cst {dimension_numbers = #tpu.dot_dimension_numbers<[1], [0], [0], [1], [0, 0, 1, 1], [], []>} : vector<32x128xf32>, vector<128x64xf32>, vector<32x64xf32> -> vector<32x64xf32>
    %c0_4 = arith.constant 0 : index
    %c0_5 = arith.constant 0 : index
    %c0_6 = arith.constant 0 : index
    %4 = vector.load %arg4[%c0_4, %c0_5, %c0_6] : memref<2x32x1xf32, #tpu.memory_space<vmem>>, vector<1x32x1xf32>
    %5 = vector.shape_cast %4 : vector<1x32x1xf32> to vector<32x1xf32>
    %6 = vector.broadcast %5 : vector<32x1xf32> to vector<32x64xf32>
    %7 = arith.addf %3, %6 : vector<32x64xf32>
    %c0_7 = arith.constant 0 : index
    %c0_8 = arith.constant 0 : index
    %c0_9 = arith.constant 0 : index
    %8 = vector.load %arg7[%c0_7, %c0_8, %c0_9] : memref<2x64x64xf32, #tpu.memory_space<vmem>>, vector<1x64x64xf32>
    %9 = vector.shape_cast %8 : vector<1x64x64xf32> to vector<64x64xf32>
    %cst_10 = arith.constant dense<0.000000e+00> : vector<32x64xf32>
    %10 = tpu.matmul %7, %9, %cst_10 {dimension_numbers = #tpu.dot_dimension_numbers<[1], [0], [0], [1], [0, 0, 1, 1], [], []>} : vector<32x64xf32>, vector<64x64xf32>, vector<32x64xf32> -> vector<32x64xf32>
    %c0_11 = arith.constant 0 : index
    %c0_12 = arith.constant 0 : index
    %c0_13 = arith.constant 0 : index
    %11 = vector.load %arg8[%c0_11, %c0_12, %c0_13] : memref<2x1x64xf32, #tpu.memory_space<vmem>>, vector<1x1x64xf32>
    %12 = vector.shape_cast %11 : vector<1x1x64xf32> to vector<1x64xf32>
    %13 = vector.broadcast %12 : vector<1x64xf32> to vector<32x64xf32>
    %14 = arith.addf %10, %13 : vector<32x64xf32>
    %15 = vector.extract_strided_slice %14 {offsets = [0, 0], sizes = [32, 32], strides = [1, 1]} : vector<32x64xf32> to vector<32x32xf32>
    %16 = vector.extract_strided_slice %14 {offsets = [0, 32], sizes = [32, 32], strides = [1, 1]} : vector<32x64xf32> to vector<32x32xf32>
    %c0_14 = arith.constant 0 : index
    %c0_15 = arith.constant 0 : index
    %c0_16 = arith.constant 0 : index
    %17 = vector.load %arg1[%c0_14, %c0_15, %c0_16] : memref<2x16x32xf32, #tpu.memory_space<vmem>>, vector<1x16x32xf32>
    %18 = vector.shape_cast %17 : vector<1x16x32xf32> to vector<16x32xf32>
    %c0_17 = arith.constant 0 : index
    %c0_18 = arith.constant 0 : index
    %c0_19 = arith.constant 0 : index
    %19 = vector.load %arg5[%c0_17, %c0_18, %c0_19] : memref<2x32x32xf32, #tpu.memory_space<vmem>>, vector<1x32x32xf32>
    %20 = vector.shape_cast %19 : vector<1x32x32xf32> to vector<32x32xf32>
    %cst_20 = arith.constant dense<0.000000e+00> : vector<16x32xf32>
    %21 = tpu.matmul %18, %20, %cst_20 {dimension_numbers = #tpu.dot_dimension_numbers<[1], [0], [0], [1], [0, 0, 1, 1], [], []>} : vector<16x32xf32>, vector<32x32xf32>, vector<16x32xf32> -> vector<16x32xf32>
    %c0_21 = arith.constant 0 : index
    %c0_22 = arith.constant 0 : index
    %c0_23 = arith.constant 0 : index
    %22 = vector.load %arg6[%c0_21, %c0_22, %c0_23] : memref<2x1x32xf32, #tpu.memory_space<vmem>>, vector<1x1x32xf32>
    %23 = vector.shape_cast %22 : vector<1x1x32xf32> to vector<1x32xf32>
    %24 = vector.broadcast %23 : vector<1x32xf32> to vector<16x32xf32>
    %25 = arith.addf %21, %24 : vector<16x32xf32>
    %c0_24 = arith.constant 0 : index
    %c0_25 = arith.constant 0 : index
    %c0_26 = arith.constant 0 : index
    %26 = vector.load %arg9[%c0_24, %c0_25, %c0_26] : memref<2x32x64xf32, #tpu.memory_space<vmem>>, vector<1x32x64xf32>
    %27 = vector.shape_cast %26 : vector<1x32x64xf32> to vector<32x64xf32>
    %c0_27 = arith.constant 0 : index
    %c0_28 = arith.constant 0 : index
    %c0_29 = arith.constant 0 : index
    %28 = vector.load %arg10[%c0_27, %c0_28, %c0_29] : memref<2x1x64xf32, #tpu.memory_space<vmem>>, vector<1x1x64xf32>
    %29 = vector.shape_cast %28 : vector<1x1x64xf32> to vector<1x64xf32>
    %30 = vector.extract_strided_slice %25 {offsets = [0, 0], sizes = [16, 16], strides = [1, 1]} : vector<16x32xf32> to vector<16x16xf32>
    %31 = vector.extract_strided_slice %15 {offsets = [0, 0], sizes = [32, 16], strides = [1, 1]} : vector<32x32xf32> to vector<32x16xf32>
    "tpu.trace_start"() <{level = 10 : i32, message = "me,se->ms"}> : () -> ()
    %cst_30 = arith.constant dense<0.000000e+00> : vector<16x32xf32>
    %32 = tpu.matmul %30, %31, %cst_30 {dimension_numbers = #tpu.dot_dimension_numbers<[1], [1], [0], [0], [0, 0, 1, 0], [], []>} : vector<16x16xf32>, vector<32x16xf32>, vector<16x32xf32> -> vector<16x32xf32>
    "tpu.trace_stop"() : () -> ()
    %cst_31 = arith.constant dense<0xFF800000> : vector<16xf32>
    %33 = vector.multi_reduction <maximumf>, %32, %cst_31 [1] : vector<16x32xf32> to vector<16xf32>
    %34 = vector.shape_cast %33 : vector<16xf32> to vector<16x1xf32>
    %35 = vector.broadcast %34 : vector<16x1xf32> to vector<16x32xf32>
    %36 = arith.subf %32, %35 : vector<16x32xf32>
    %37 = math.exp %36 : vector<16x32xf32>
    %cst_32 = arith.constant dense<0.000000e+00> : vector<16xf32>
    %38 = vector.multi_reduction <add>, %37, %cst_32 [1] : vector<16x32xf32> to vector<16xf32>
    %39 = vector.shape_cast %38 : vector<16xf32> to vector<16x1xf32>
    %40 = tpu.reciprocal %39 {approx = true} : vector<16x1xf32> -> vector<16x1xf32>
    %41 = vector.broadcast %40 : vector<16x1xf32> to vector<16x32xf32>
    %42 = arith.mulf %37, %41 : vector<16x32xf32>
    %43 = vector.extract_strided_slice %16 {offsets = [0, 0], sizes = [32, 16], strides = [1, 1]} : vector<32x32xf32> to vector<32x16xf32>
    %cst_33 = arith.constant dense<0.000000e+00> : vector<16x16xf32>
    %44 = tpu.matmul %42, %43, %cst_33 {dimension_numbers = #tpu.dot_dimension_numbers<[1], [0], [0], [1], [0, 0, 1, 1], [], []>} : vector<16x32xf32>, vector<32x16xf32>, vector<16x16xf32> -> vector<16x16xf32>
    %45 = vector.extract_strided_slice %27 {offsets = [0, 0], sizes = [16, 64], strides = [1, 1]} : vector<32x64xf32> to vector<16x64xf32>
    %cst_34 = arith.constant dense<0.000000e+00> : vector<16x64xf32>
    %46 = tpu.matmul %44, %45, %cst_34 {dimension_numbers = #tpu.dot_dimension_numbers<[1], [0], [0], [1], [0, 0, 1, 1], [], []>} : vector<16x16xf32>, vector<16x64xf32>, vector<16x64xf32> -> vector<16x64xf32>
    %47 = vector.broadcast %29 : vector<1x64xf32> to vector<16x64xf32>
    %48 = arith.addf %47, %46 : vector<16x64xf32>
    %49 = vector.extract_strided_slice %25 {offsets = [0, 16], sizes = [16, 16], strides = [1, 1]} : vector<16x32xf32> to vector<16x16xf32>
    %50 = vector.extract_strided_slice %15 {offsets = [0, 16], sizes = [32, 16], strides = [1, 1]} : vector<32x32xf32> to vector<32x16xf32>
    "tpu.trace_start"() <{level = 10 : i32, message = "me,se->ms"}> : () -> ()
    %cst_35 = arith.constant dense<0.000000e+00> : vector<16x32xf32>
    %51 = tpu.matmul %49, %50, %cst_35 {dimension_numbers = #tpu.dot_dimension_numbers<[1], [1], [0], [0], [0, 0, 1, 0], [], []>} : vector<16x16xf32>, vector<32x16xf32>, vector<16x32xf32> -> vector<16x32xf32>
    "tpu.trace_stop"() : () -> ()
    %cst_36 = arith.constant dense<0xFF800000> : vector<16xf32>
    %52 = vector.multi_reduction <maximumf>, %51, %cst_36 [1] : vector<16x32xf32> to vector<16xf32>
    %53 = vector.shape_cast %52 : vector<16xf32> to vector<16x1xf32>
    %54 = vector.broadcast %53 : vector<16x1xf32> to vector<16x32xf32>
    %55 = arith.subf %51, %54 : vector<16x32xf32>
    %56 = math.exp %55 : vector<16x32xf32>
    %cst_37 = arith.constant dense<0.000000e+00> : vector<16xf32>
    %57 = vector.multi_reduction <add>, %56, %cst_37 [1] : vector<16x32xf32> to vector<16xf32>
    %58 = vector.shape_cast %57 : vector<16xf32> to vector<16x1xf32>
    %59 = tpu.reciprocal %58 {approx = true} : vector<16x1xf32> -> vector<16x1xf32>
    %60 = vector.broadcast %59 : vector<16x1xf32> to vector<16x32xf32>
    %61 = arith.mulf %56, %60 : vector<16x32xf32>
    %62 = vector.extract_strided_slice %16 {offsets = [0, 16], sizes = [32, 16], strides = [1, 1]} : vector<32x32xf32> to vector<32x16xf32>
    %cst_38 = arith.constant dense<0.000000e+00> : vector<16x16xf32>
    %63 = tpu.matmul %61, %62, %cst_38 {dimension_numbers = #tpu.dot_dimension_numbers<[1], [0], [0], [1], [0, 0, 1, 1], [], []>} : vector<16x32xf32>, vector<32x16xf32>, vector<16x16xf32> -> vector<16x16xf32>
    %64 = vector.extract_strided_slice %27 {offsets = [16, 0], sizes = [16, 64], strides = [1, 1]} : vector<32x64xf32> to vector<16x64xf32>
    %cst_39 = arith.constant dense<0.000000e+00> : vector<16x64xf32>
    %65 = tpu.matmul %63, %64, %cst_39 {dimension_numbers = #tpu.dot_dimension_numbers<[1], [0], [0], [1], [0, 0, 1, 1], [], []>} : vector<16x16xf32>, vector<16x64xf32>, vector<16x64xf32> -> vector<16x64xf32>
    %66 = arith.addf %48, %65 : vector<16x64xf32>
    %c1 = arith.constant 1 : index
    %c0_40 = arith.constant 0 : index
    %c0_41 = arith.constant 0 : index
    %67 = vector.load %arg3[%c1, %c0_40, %c0_41] : memref<2x32x128xf32, #tpu.memory_space<vmem>>, vector<1x32x128xf32>
    %68 = vector.shape_cast %67 : vector<1x32x128xf32> to vector<32x128xf32>
    %cst_42 = arith.constant dense<0.000000e+00> : vector<32x64xf32>
    %69 = tpu.matmul %68, %0, %cst_42 {dimension_numbers = #tpu.dot_dimension_numbers<[1], [0], [0], [1], [0, 0, 1, 1], [], []>} : vector<32x128xf32>, vector<128x64xf32>, vector<32x64xf32> -> vector<32x64xf32>
    %c1_43 = arith.constant 1 : index
    %c0_44 = arith.constant 0 : index
    %c0_45 = arith.constant 0 : index
    %70 = vector.load %arg4[%c1_43, %c0_44, %c0_45] : memref<2x32x1xf32, #tpu.memory_space<vmem>>, vector<1x32x1xf32>
    %71 = vector.shape_cast %70 : vector<1x32x1xf32> to vector<32x1xf32>
    %72 = vector.broadcast %71 : vector<32x1xf32> to vector<32x64xf32>
    %73 = arith.addf %69, %72 : vector<32x64xf32>
    %c1_46 = arith.constant 1 : index
    %c0_47 = arith.constant 0 : index
    %c0_48 = arith.constant 0 : index
    %74 = vector.load %arg7[%c1_46, %c0_47, %c0_48] : memref<2x64x64xf32, #tpu.memory_space<vmem>>, vector<1x64x64xf32>
    %75 = vector.shape_cast %74 : vector<1x64x64xf32> to vector<64x64xf32>
    %cst_49 = arith.constant dense<0.000000e+00> : vector<32x64xf32>
    %76 = tpu.matmul %73, %75, %cst_49 {dimension_numbers = #tpu.dot_dimension_numbers<[1], [0], [0], [1], [0, 0, 1, 1], [], []>} : vector<32x64xf32>, vector<64x64xf32>, vector<32x64xf32> -> vector<32x64xf32>
    %c1_50 = arith.constant 1 : index
    %c0_51 = arith.constant 0 : index
    %c0_52 = arith.constant 0 : index
    %77 = vector.load %arg8[%c1_50, %c0_51, %c0_52] : memref<2x1x64xf32, #tpu.memory_space<vmem>>, vector<1x1x64xf32>
    %78 = vector.shape_cast %77 : vector<1x1x64xf32> to vector<1x64xf32>
    %79 = vector.broadcast %78 : vector<1x64xf32> to vector<32x64xf32>
    %80 = arith.addf %76, %79 : vector<32x64xf32>
    %81 = vector.extract_strided_slice %80 {offsets = [0, 0], sizes = [32, 32], strides = [1, 1]} : vector<32x64xf32> to vector<32x32xf32>
    %82 = vector.extract_strided_slice %80 {offsets = [0, 32], sizes = [32, 32], strides = [1, 1]} : vector<32x64xf32> to vector<32x32xf32>
    %c1_53 = arith.constant 1 : index
    %c0_54 = arith.constant 0 : index
    %c0_55 = arith.constant 0 : index
    %83 = vector.load %arg1[%c1_53, %c0_54, %c0_55] : memref<2x16x32xf32, #tpu.memory_space<vmem>>, vector<1x16x32xf32>
    %84 = vector.shape_cast %83 : vector<1x16x32xf32> to vector<16x32xf32>
    %c1_56 = arith.constant 1 : index
    %c0_57 = arith.constant 0 : index
    %c0_58 = arith.constant 0 : index
    %85 = vector.load %arg5[%c1_56, %c0_57, %c0_58] : memref<2x32x32xf32, #tpu.memory_space<vmem>>, vector<1x32x32xf32>
    %86 = vector.shape_cast %85 : vector<1x32x32xf32> to vector<32x32xf32>
    %cst_59 = arith.constant dense<0.000000e+00> : vector<16x32xf32>
    %87 = tpu.matmul %84, %86, %cst_59 {dimension_numbers = #tpu.dot_dimension_numbers<[1], [0], [0], [1], [0, 0, 1, 1], [], []>} : vector<16x32xf32>, vector<32x32xf32>, vector<16x32xf32> -> vector<16x32xf32>
    %c1_60 = arith.constant 1 : index
    %c0_61 = arith.constant 0 : index
    %c0_62 = arith.constant 0 : index
    %88 = vector.load %arg6[%c1_60, %c0_61, %c0_62] : memref<2x1x32xf32, #tpu.memory_space<vmem>>, vector<1x1x32xf32>
    %89 = vector.shape_cast %88 : vector<1x1x32xf32> to vector<1x32xf32>
    %90 = vector.broadcast %89 : vector<1x32xf32> to vector<16x32xf32>
    %91 = arith.addf %87, %90 : vector<16x32xf32>
    %c1_63 = arith.constant 1 : index
    %c0_64 = arith.constant 0 : index
    %c0_65 = arith.constant 0 : index
    %92 = vector.load %arg9[%c1_63, %c0_64, %c0_65] : memref<2x32x64xf32, #tpu.memory_space<vmem>>, vector<1x32x64xf32>
    %93 = vector.shape_cast %92 : vector<1x32x64xf32> to vector<32x64xf32>
    %c1_66 = arith.constant 1 : index
    %c0_67 = arith.constant 0 : index
    %c0_68 = arith.constant 0 : index
    %94 = vector.load %arg10[%c1_66, %c0_67, %c0_68] : memref<2x1x64xf32, #tpu.memory_space<vmem>>, vector<1x1x64xf32>
    %95 = vector.shape_cast %94 : vector<1x1x64xf32> to vector<1x64xf32>
    %96 = vector.extract_strided_slice %91 {offsets = [0, 0], sizes = [16, 16], strides = [1, 1]} : vector<16x32xf32> to vector<16x16xf32>
    %97 = vector.extract_strided_slice %81 {offsets = [0, 0], sizes = [32, 16], strides = [1, 1]} : vector<32x32xf32> to vector<32x16xf32>
    "tpu.trace_start"() <{level = 10 : i32, message = "me,se->ms"}> : () -> ()
    %cst_69 = arith.constant dense<0.000000e+00> : vector<16x32xf32>
    %98 = tpu.matmul %96, %97, %cst_69 {dimension_numbers = #tpu.dot_dimension_numbers<[1], [1], [0], [0], [0, 0, 1, 0], [], []>} : vector<16x16xf32>, vector<32x16xf32>, vector<16x32xf32> -> vector<16x32xf32>
    "tpu.trace_stop"() : () -> ()
    %cst_70 = arith.constant dense<0xFF800000> : vector<16xf32>
    %99 = vector.multi_reduction <maximumf>, %98, %cst_70 [1] : vector<16x32xf32> to vector<16xf32>
    %100 = vector.shape_cast %99 : vector<16xf32> to vector<16x1xf32>
    %101 = vector.broadcast %100 : vector<16x1xf32> to vector<16x32xf32>
    %102 = arith.subf %98, %101 : vector<16x32xf32>
    %103 = math.exp %102 : vector<16x32xf32>
    %cst_71 = arith.constant dense<0.000000e+00> : vector<16xf32>
    %104 = vector.multi_reduction <add>, %103, %cst_71 [1] : vector<16x32xf32> to vector<16xf32>
    %105 = vector.shape_cast %104 : vector<16xf32> to vector<16x1xf32>
    %106 = tpu.reciprocal %105 {approx = true} : vector<16x1xf32> -> vector<16x1xf32>
    %107 = vector.broadcast %106 : vector<16x1xf32> to vector<16x32xf32>
    %108 = arith.mulf %103, %107 : vector<16x32xf32>
    %109 = vector.extract_strided_slice %82 {offsets = [0, 0], sizes = [32, 16], strides = [1, 1]} : vector<32x32xf32> to vector<32x16xf32>
    %cst_72 = arith.constant dense<0.000000e+00> : vector<16x16xf32>
    %110 = tpu.matmul %108, %109, %cst_72 {dimension_numbers = #tpu.dot_dimension_numbers<[1], [0], [0], [1], [0, 0, 1, 1], [], []>} : vector<16x32xf32>, vector<32x16xf32>, vector<16x16xf32> -> vector<16x16xf32>
    %111 = vector.extract_strided_slice %93 {offsets = [0, 0], sizes = [16, 64], strides = [1, 1]} : vector<32x64xf32> to vector<16x64xf32>
    %cst_73 = arith.constant dense<0.000000e+00> : vector<16x64xf32>
    %112 = tpu.matmul %110, %111, %cst_73 {dimension_numbers = #tpu.dot_dimension_numbers<[1], [0], [0], [1], [0, 0, 1, 1], [], []>} : vector<16x16xf32>, vector<16x64xf32>, vector<16x64xf32> -> vector<16x64xf32>
    %113 = vector.broadcast %95 : vector<1x64xf32> to vector<16x64xf32>
    %114 = arith.addf %113, %112 : vector<16x64xf32>
    %115 = vector.extract_strided_slice %91 {offsets = [0, 16], sizes = [16, 16], strides = [1, 1]} : vector<16x32xf32> to vector<16x16xf32>
    %116 = vector.extract_strided_slice %81 {offsets = [0, 16], sizes = [32, 16], strides = [1, 1]} : vector<32x32xf32> to vector<32x16xf32>
    "tpu.trace_start"() <{level = 10 : i32, message = "me,se->ms"}> : () -> ()
    %cst_74 = arith.constant dense<0.000000e+00> : vector<16x32xf32>
    %117 = tpu.matmul %115, %116, %cst_74 {dimension_numbers = #tpu.dot_dimension_numbers<[1], [1], [0], [0], [0, 0, 1, 0], [], []>} : vector<16x16xf32>, vector<32x16xf32>, vector<16x32xf32> -> vector<16x32xf32>
    "tpu.trace_stop"() : () -> ()
    %cst_75 = arith.constant dense<0xFF800000> : vector<16xf32>
    %118 = vector.multi_reduction <maximumf>, %117, %cst_75 [1] : vector<16x32xf32> to vector<16xf32>
    %119 = vector.shape_cast %118 : vector<16xf32> to vector<16x1xf32>
    %120 = vector.broadcast %119 : vector<16x1xf32> to vector<16x32xf32>
    %121 = arith.subf %117, %120 : vector<16x32xf32>
    %122 = math.exp %121 : vector<16x32xf32>
    %cst_76 = arith.constant dense<0.000000e+00> : vector<16xf32>
    %123 = vector.multi_reduction <add>, %122, %cst_76 [1] : vector<16x32xf32> to vector<16xf32>
    %124 = vector.shape_cast %123 : vector<16xf32> to vector<16x1xf32>
    %125 = tpu.reciprocal %124 {approx = true} : vector<16x1xf32> -> vector<16x1xf32>
    %126 = vector.broadcast %125 : vector<16x1xf32> to vector<16x32xf32>
    %127 = arith.mulf %122, %126 : vector<16x32xf32>
    %128 = vector.extract_strided_slice %82 {offsets = [0, 16], sizes = [32, 16], strides = [1, 1]} : vector<32x32xf32> to vector<32x16xf32>
    %cst_77 = arith.constant dense<0.000000e+00> : vector<16x16xf32>
    %129 = tpu.matmul %127, %128, %cst_77 {dimension_numbers = #tpu.dot_dimension_numbers<[1], [0], [0], [1], [0, 0, 1, 1], [], []>} : vector<16x32xf32>, vector<32x16xf32>, vector<16x16xf32> -> vector<16x16xf32>
    %130 = vector.extract_strided_slice %93 {offsets = [16, 0], sizes = [16, 64], strides = [1, 1]} : vector<32x64xf32> to vector<16x64xf32>
    %cst_78 = arith.constant dense<0.000000e+00> : vector<16x64xf32>
    %131 = tpu.matmul %129, %130, %cst_78 {dimension_numbers = #tpu.dot_dimension_numbers<[1], [0], [0], [1], [0, 0, 1, 1], [], []>} : vector<16x16xf32>, vector<16x64xf32>, vector<16x64xf32> -> vector<16x64xf32>
    %132 = arith.addf %114, %131 : vector<16x64xf32>
    %133 = tpu.concatenate %66, %132 in 1 : vector<16x64xf32>, vector<16x64xf32> -> vector<16x128xf32>
    %c0_79 = arith.constant 0 : index
    %c0_80 = arith.constant 0 : index
    %134 = vector.load %arg11[%c0_79, %c0_80] : memref<16x128xf32, #tpu.memory_space<vmem>>, vector<16x128xf32>
    tpu.vector_store %arg11[%c0_79, %c0_80], %133 {strides = array<i32>} : memref<16x128xf32, #tpu.memory_space<vmem>>, vector<16x128xf32>,
    return
  }
  func.func @transform_0(%arg0: i32) -> (i32, i32, i32) {
    %c0_i32 = arith.constant 0 : i32
    %c0_i32_0 = arith.constant 0 : i32
    %c0_i32_1 = arith.constant 0 : i32
    return %c0_i32, %arg0, %c0_i32_0 : i32, i32, i32
  }
  func.func @transform_1(%arg0: i32) -> (i32, i32) {
    %c0_i32 = arith.constant 0 : i32
    %c0_i32_0 = arith.constant 0 : i32
    %c0_i32_1 = arith.constant 0 : i32
    return %c0_i32, %c0_i32_0 : i32, i32
  }
  func.func @transform_2(%arg0: i32) -> (i32, i32, i32) {
    %c0_i32 = arith.constant 0 : i32
    %c0_i32_0 = arith.constant 0 : i32
    %c0_i32_1 = arith.constant 0 : i32
    %c0_i32_2 = arith.constant 0 : i32
    return %c0_i32, %c0_i32_0, %c0_i32_1 : i32, i32, i32
  }
  func.func @transform_3(%arg0: i32) -> (i32, i32, i32) {
    %c0_i32 = arith.constant 0 : i32
    %c0_i32_0 = arith.constant 0 : i32
    %c0_i32_1 = arith.constant 0 : i32
    %c0_i32_2 = arith.constant 0 : i32
    return %c0_i32, %c0_i32_0, %c0_i32_1 : i32, i32, i32
  }
  func.func @transform_4(%arg0: i32) -> (i32, i32, i32) {
    %c0_i32 = arith.constant 0 : i32
    %c0_i32_0 = arith.constant 0 : i32
    %c0_i32_1 = arith.constant 0 : i32
    %c0_i32_2 = arith.constant 0 : i32
    return %c0_i32, %c0_i32_0, %c0_i32_1 : i32, i32, i32
  }
  func.func @transform_5(%arg0: i32) -> (i32, i32, i32) {
    %c0_i32 = arith.constant 0 : i32
    %c0_i32_0 = arith.constant 0 : i32
    %c0_i32_1 = arith.constant 0 : i32
    %c0_i32_2 = arith.constant 0 : i32
    return %c0_i32, %c0_i32_0, %c0_i32_1 : i32, i32, i32
  }
  func.func @transform_6(%arg0: i32) -> (i32, i32, i32) {
    %c0_i32 = arith.constant 0 : i32
    %c0_i32_0 = arith.constant 0 : i32
    %c0_i32_1 = arith.constant 0 : i32
    %c0_i32_2 = arith.constant 0 : i32
    return %c0_i32, %c0_i32_0, %c0_i32_1 : i32, i32, i32
  }
  func.func @transform_7(%arg0: i32) -> (i32, i32, i32) {
    %c0_i32 = arith.constant 0 : i32
    %c0_i32_0 = arith.constant 0 : i32
    %c0_i32_1 = arith.constant 0 : i32
    %c0_i32_2 = arith.constant 0 : i32
    return %c0_i32, %c0_i32_0, %c0_i32_1 : i32, i32, i32
  }
  func.func @transform_8(%arg0: i32) -> (i32, i32, i32) {
    %c0_i32 = arith.constant 0 : i32
    %c0_i32_0 = arith.constant 0 : i32
    %c0_i32_1 = arith.constant 0 : i32
    %c0_i32_2 = arith.constant 0 : i32
    return %c0_i32, %c0_i32_0, %c0_i32_1 : i32, i32, i32
  }
  func.func @transform_9(%arg0: i32) -> (i32, i32, i32) {
    %c0_i32 = arith.constant 0 : i32
    %c0_i32_0 = arith.constant 0 : i32
    %c0_i32_1 = arith.constant 0 : i32
    %c0_i32_2 = arith.constant 0 : i32
    return %c0_i32, %c0_i32_0, %c0_i32_1 : i32, i32, i32
  }
  func.func @transform_10(%arg0: i32) -> (i32, i32) {
    %c0_i32 = arith.constant 0 : i32
    %c0_i32_0 = arith.constant 0 : i32
    return %arg0, %c0_i32 : i32, i32
  }
}

</mosaic_0001>

<bundles_post_ra>
// kernel: tpu_custom_call.1
= control target key start
LH: loop header
LB: loop body
LE: loop exit
PB: predicated region body
PF: predicated region fallthrough
CT: control target
= control target key end

     0   :  { %s4105_s0 = inlined_call_operand.vmem [shape: f32[2,32,32], index: 0, kind: input, shape index: {}]   ;;  %s4106_s1 = inlined_call_operand.vmem [shape: f32[128,64], index: 1, kind: input, shape index: {}]   ;;  %s4107_s2 = inlined_call_operand.hbm [shape: f32[2,32,128], index: 2, kind: input, shape index: {}]   ;;  %s4108_s3 = inlined_call_operand.vmem [shape: f32[2,32,1], index: 3, kind: input, shape index: {}]   ;;  %s4109_s4 = inlined_call_operand.hbm [shape: f32[2,32,32], index: 4, kind: input, shape index: {}]   ;;  %s4110_s5 = inlined_call_operand.vmem [shape: f32[2,1,32], index: 5, kind: input, shape index: {}]   ;;  %s4111_s6 = inlined_call_operand.vmem [shape: f32[2,64,64], index: 6, kind: input, shape index: {}]   ;;  %s4112_s7 = inlined_call_operand.vmem [shape: f32[2,1,64], index: 7, kind: input, shape index: {}]   ;;  %s4113_s8 = inlined_call_operand.hbm [shape: f32[2,32,64], index: 8, kind: input, shape index: {}]   ;;  %s4114_s9 = inlined_call_operand.vmem [shape: f32[2,1,64], index: 9, kind: input, shape index: {}]   ;;  %s4115_s10 = inlined_call_operand.hbm [shape: f32[32,128], index: 10, kind: output, shape index: {}]  }
   0x1   :  { %4127 = sst [smem:[#allocation18_spill]] %s4114_s9 }
   0x2   :  { %4128 = sst [smem:[#allocation19_spill]] %s4115_s10 }
   0x3   :  { %15 = vsyncpa [#allocation4], 0 }
   0x4   :  { %16 = vsyncpa [#allocation7], 0 }
   0x5   :  { %17 = vsyncpa [#allocation5], 0 }
   0x6   :  { %19 = vsyncpa [#allocation5 + $0x1], 0  ;;  %s3548_s13 = smov 0   ;;  %s3550_s14 = smov 0  }
   0x7   :  { %s3552_s15 = smov 0   ;;  %s3554_s16 = smov 0  }
   0x8 LB: > { %4129 = sst [smem:[#allocation13_spill]] %s3466_s13  ;;  %s3569_s17 = sadd.s32 4294967295, %s3478_s16   ;;  %s3478_s16 = sphi %s3554_s16, %s4156_s16   ;;  %s3474_s15 = sphi %s3552_s15, %s4160_s15   ;;  %s3470_s14 = sphi %s3550_s14, %s4159_s14   ;;  %s3466_s13 = sphi %s3548_s13, %s4158_s13  }
   0x9   : > { %s2440_s18 = sadd.s32 4294967294, %s3478_s16   ;;  %s3573_s19 = sadd.s32 1, %s3478_s16  }
   0xa   : > { %4130 = sst [smem:[#allocation14_spill]] %s3573_s19  ;;  %s32_s20 = sadd.s32 1, %s3474_s15 }
   0xb   : > { %s29_s21 = ssub.s32 %s3478_s16, %s3573_s19  ;;  %p39_p0 = scmp.ne.s32.totalorder %s3474_s15, %s3470_s14 }
   0xc   : > { %p30_p1 = scmp.eq.s32.totalorder %s29_s21, 0  ;;  %p40_p2 = scmp.eq.s32.totalorder %s3478_s16, 0 }
   0xd   : > { %p258_p3 = scmp.eq.s32.totalorder %s3569_s17, 1  ;;  %p263_p4 = scmp.ne.s32.totalorder %s3470_s14, %s3466_s13 }
   0xe   : > { %s3585_s22 = scalar_select %p30_p1, %s3474_s15, %s32_s20  }
   0xf   : > { %p3587_p5 = por %p40_p2, %p39_p0  ;;  %p3591_p6 = por %p258_p3, %p39_p0 }
  0x10   : > { %4131 = sst [smem:[#allocation15_spill]] %s3585_s22  ;;  %p264_p7 = scmp.eq.s32.totalorder %s2440_s18, 1 }
  0x11   : > { %s4132_s23 = scalar_select %p3587_p5, 1, 0 }
  0x12   : > { %s4133_s24 = scalar_select %p3591_p6, 1, 0 }
  0x13   : > { %p2441_p8 = scmp.ge.s32.totalorder %s3478_s16, 1  ;;  %p271_p9 = scmp.lt.s32.totalorder %s3478_s16, 3 }
  0x14   : > { %4134 = sst [smem:[#allocation16_spill]] %s4133_s24  ;;  %p3597_p10 = por %p264_p7, %p263_p4 }
  0x15   : > { %p4119_p11 = scmp.eq.s32.totalorder %s3569_s17, 0  ;;  %p3602_p12 = pnand %p2441_p8, %p271_p9 }
  0x16   : > { %s4135_s25 = scalar_select %p3597_p10, 1, 0 }
  0x17   : > { %s4137_s26 = scalar_select %p3602_p12, 1, 0 }
  0x18   : > { %4136 = sst [smem:[#allocation17_spill]] %s4135_s25  ;;  %p3165_p13 = pneg %p3602_p12 }
  0x19   : > { %s3480_s27 = smov [#allocation6]   ;;  %s3481_s30 = smov [#allocation3]  }
  0x1a   : > { %s302_s28 = sshll.u32 %s3480_s27, 4  ;;  %p3612_p0 = pnand %p4119_p11, %p3165_p13  ;;  %s3608_s28 = int_to_ptr.vmem [resolvable:$true] %s302_s28 }
  0x1b   : > { %s286_s11 = sshll.u32 %s3481_s30, 4  ;;  %s3482_s12 = smov [#allocation8]   ;;  %s3616_s11 = int_to_ptr.vmem [resolvable:$true] %s286_s11 }
  0x1c   : > { %s3618_s18 = sshll.u32 %s3482_s12, 4  ;;  %s3324_s22 = scalar_lea.hbm %s4109_s4, 1024  ;;  %s325_s18 = int_to_ptr.vmem [resolvable:$true] %s3618_s18 }
  0x1d   : > { %p3325_p1 = scmp.ne.s32.totalorder %s4109_s4, %s3324_s22  ;;  %p3628_p2 = pneg %p3612_p0 }
  0x1e   : > { %p3331_p7 = scmp.lt.u32.totalorder %s3324_s22, %s4109_s4 }
  0x1f   : > { %p3327_p3 = pnand %p3628_p2, %p3325_p1 }
  0x21   : > { %p3328_p4 = pneg %p3327_p3 }
  0x23   : > { %p3333_p8 = pnand %p3331_p7, %p3328_p4 }
  0x25   : > { %3336 = shalt.err (!%p3333_p8)
}
  0x26   : > { %s3337_s19 = scalar_lea.vmem %s3608_s28, 1024  ;;  %p3345_p10 = scmp.lt.s32.totalorder %s3608_s28, %s3608_s28 }
  0x27   : > { %p3338_p9 = scmp.ne.s32.totalorder %s3608_s28, %s3337_s19  ;;  %p3346_p6 = scmp.lt.s32.totalorder %s3337_s19, %s3337_s19 }
  0x29   : > { %p3340_p13 = pnand %p3338_p9, %p3628_p2  ;;  %p3347_p1 = por %p3346_p6, %p3345_p10 }
  0x2b   : > { %p3341_p11 = pneg %p3340_p13 }
  0x2d   : > { %p3348_p3 = pnand %p3347_p1, %p3341_p11 }
  0x2f   : > { %3351 = shalt.err (!%p3348_p3)
}
  0x30   : > { %s3483_s20 = smov 128   ;;  %s3484_s22 = smov 8  }
  0x31   : > { %3171 = dma.hbm_to_vmem [thread:$0]  (!%p3612_p0), %s4109_s4, 1024, %s3608_s28, [#allocation7], %s3483_s20, %s3483_s20, %s3484_s22  }
  0x32   : > { %s3352_s19 = scalar_lea.hbm %s4107_s2, 1024 }
  0x33   : > { %p3353_p6 = scmp.ne.s32.totalorder %s4107_s2, %s3352_s19  ;;  %p3359_p4 = scmp.lt.u32.totalorder %s3352_s19, %s4107_s2 }
  0x35   : > { %p3355_p10 = pnand %p3353_p6, %p3628_p2 }
  0x37   : > { %p3356_p11 = pneg %p3355_p10 }
  0x39   : > { %p3361_p7 = pnand %p3359_p4, %p3356_p11 }
  0x3b   : > { %3364 = shalt.err (!%p3361_p7)
}
  0x3c   : > { %s3365_s28 = scalar_lea.vmem %s3616_s11, 1024  ;;  %p3373_p1 = scmp.lt.s32.totalorder %s3616_s11, %s3616_s11 }
  0x3d   : > { %p3366_p8 = scmp.ne.s32.totalorder %s3616_s11, %s3365_s28  ;;  %p3374_p3 = scmp.lt.s32.totalorder %s3365_s28, %s3365_s28 }
  0x3f   : > { %p3368_p9 = pnand %p3366_p8, %p3628_p2  ;;  %p3375_p6 = por %p3374_p3, %p3373_p1 }
  0x41   : > { %p3369_p13 = pneg %p3368_p9 }
  0x43   : > { %p3376_p10 = pnand %p3375_p6, %p3369_p13 }
  0x45   : > { %3379 = shalt.err (!%p3376_p10)
}
  0x46   : > { %3168 = dma.hbm_to_vmem [thread:$0]  (!%p3612_p0), %s4107_s2, 1024, %s3616_s11, [#allocation4], %s3483_s20, %s3483_s20, %s3484_s22  }
  0x47   : > { %s3380_s21 = scalar_lea.hbm %s4113_s8, 1024 }
  0x48   : > { %p3381_p11 = scmp.ne.s32.totalorder %s4113_s8, %s3380_s21  ;;  %p3387_p8 = scmp.lt.u32.totalorder %s3380_s21, %s4113_s8 }
  0x4a   : > { %p3383_p4 = pnand %p3381_p11, %p3628_p2 }
  0x4c   : > { %p3384_p7 = pneg %p3383_p4 }
  0x4e   : > { %p3389_p9 = pnand %p3387_p8, %p3384_p7 }
  0x50   : > { %3392 = shalt.err (!%p3389_p9)
}
  0x51   : > { %s3393_s28 = scalar_lea.vmem %s325_s18, 1024  ;;  %p3401_p6 = scmp.lt.s32.totalorder %s325_s18, %s325_s18 }
  0x52   : > { %p3394_p13 = scmp.ne.s32.totalorder %s325_s18, %s3393_s28  ;;  %p3402_p10 = scmp.lt.s32.totalorder %s3393_s28, %s3393_s28 }
  0x54   : > { %p3396_p1 = pnand %p3394_p13, %p3628_p2  ;;  %p3403_p12 = por %p3402_p10, %p3401_p6 }
  0x56   : > { %p3397_p3 = pneg %p3396_p1 }
  0x58   : > { %p3404_p5 = pnand %p3403_p12, %p3397_p3 }
  0x5a   : > { %3407 = shalt.err (!%p3404_p5)
}
  0x5b   : > { %3174 = dma.hbm_to_vmem [thread:$0]  (!%p3612_p0), %s4113_s8, 1024, %s325_s18, [#allocation7], %s3483_s20, %s3483_s20, %s3484_s22  }
  0x5c   : > { %p2445_p11 = scmp.ge.s32.totalorder %s3478_s16, 2 }
  0x5d   : > { %p4140_p2 = scmp.ne.s32.totalorder (!%p2445_p11), %s4132_s23, 0 }
  0x5e   : > { %337 = sbr.rel (%p2445_p11) target bundleno = 108 (0x6c), region = 52 }
  0x65   : > { %340 = sbr.rel (!%p4140_p2) target bundleno = 108 (0x6c), region = 56  ;;  %s342_s25 = sand.u32 (%p4140_p2), 1, %s3474_s15  }
  0x66   : > { %s2535_s10 = sshll.u32 (%p4140_p2), %s3478_s16, 4  ;;  %s2446_s29 = sshll.u32 (%p4140_p2), %s342_s25, 5 }
  0x67   : > { %s347_s21 = scalar_lea.vmem (%p4140_p2), %s4105_s0, %s2535_s10  ;;  %s344_s18 = scalar_lea.vmem (%p4140_p2), [#allocation2], %s2446_s29 }
  0x68   : > { %v381_v0 = vld [vmem:[%s347_s21] sm:$0xff] (%p4140_p2)  ;;  %v383_v1 = vld [vmem:[%s347_s21 + $0x8] sm:$0xff] (%p4140_p2) }
  0x69   : > { %v385_v2 = vld [vmem:[%s347_s21 + $0x20] sm:$0xff] (%p4140_p2)  ;;  %382 = vst [vmem:[%s344_s18] sm:$0xff] (%p4140_p2), %v381_v0  ;;  %384 = vst [vmem:[%s344_s18 + $0x8] sm:$0xff] (%p4140_p2), %v383_v1  ;;  %v387_v3 = vld [vmem:[%s347_s21 + $0x28] sm:$0xff] (%p4140_p2) }
  0x6a   : > { %386 = vst [vmem:[%s344_s18 + $0x10] sm:$0xff] (%p4140_p2), %v385_v2  ;;  %388 = vst [vmem:[%s344_s18 + $0x18] sm:$0xff] (%p4140_p2), %v387_v3 }
  0x6c PF: > { %p4141_p5 = scmp.ne.s32.totalorder %s4137_s26, 0 }
  0x6d   : > { %s3713_s23 = sand.u32 (!%p4141_p5), 1, %s3470_s14   ;;  %p4142_p12 = scmp.eq.s32.totalorder (!%p4141_p5), %s3569_s17, 0 }
  0x6e   : > { %397 = sbr.rel (%p4141_p5) target bundleno = 3371 (0xd2b), region = 94  ;;  %s2450_s20 = sshll.u32 (!%p4141_p5), %s3713_s23, 5 }
  0x6f   : > { %s3716_s22 = scalar_lea.vmem (!%p4141_p5), [#allocation2], %s2450_s20 }
  0x75   : > { %3453 = dma.done.wait (%p4142_p12), [#allocation4], 1024   ;;  %p4143_p0 = pmov %p4142_p12 }
  0x77   : > { %3455 = vsyncadd (%p4143_p0), [#allocation4], 4294966272  ;;  %p4144_p4 = pmov %p4143_p0 }
  0x78   : > { %p4145_p7 = pmov %p4143_p0 }
  0x79   : > { %3457 = dma.done.wait (%p4144_p4), [#allocation7], 2048  }
  0x7a   : > { %3459 = vsyncadd (%p4145_p7), [#allocation7], 4294965248  ;;  %v3485_v4 = vmov 0   ;;  %v451_v5 = vld [vmem:[%s4106_s1] sm:$0xff]  ;;  %v452_v6 = vld [vmem:[%s4106_s1 + $0x8] sm:$0xff]  ;;  %vm595_vm0 = vcmask 523264  }
  0x7b   : > { %3230 = vset.pattern.permute.xlu0 %v3485_v4  ;;  %3231 = vset.pattern.permute.xlu1 %v3485_v4  ;;  %v453_v7 = vld [vmem:[%s4106_s1 + $0x10] sm:$0xff]  ;;  %v3735_v8 = vpack.c.bf16 %v452_v6, %v451_v5  ;;  %v454_v9 = vld [vmem:[%s4106_s1 + $0x18] sm:$0xff]  ;;  %v455_v11 = vld [vmem:[%s4106_s1 + $0x20] sm:$0xff]  ;;  %vm706_vm1 = vcmask 261120   ;;  %vm793_vm2 = vcmask 130048   ;;  %s3486_s29 = smov 112  }
  0x7c   : > { %v3740_v10 = vpack.c.bf16 %v454_v9, %v453_v7  ;;  %v456_v12 = vld [vmem:[%s4106_s1 + $0x28] sm:$0xff]  ;;  %v467_v14 = vld [vmem:[#allocation3] sm:$0xff]  ;;  %v457_v15 = vld [vmem:[%s4106_s1 + $0x30] sm:$0xff]  ;;  %s3487_s21 = smov 96   ;;  %s3488_s18 = smov 80  }
  0x7d   : > { %2936 = vmatprep.subr.bf16.mxu0 %v3735_v8  ;;  %v3751_v13 = vpack.c.bf16 %v456_v12, %v455_v11  ;;  %v458_v16 = vld [vmem:[%s4106_s1 + $0x38] sm:$0xff]  ;;  %2709 = vmatprep.mubr.f32.mxu0 %v467_v14  ;;  %v471_v17 = vld [vmem:[%s4108_s3] sm:$0xff]  ;;  %v472_v18 = vld [vmem:[%s4108_s3 + $0x8] sm:$0xff]  ;;  %s3489_s26 = smov 64   ;;  %s2454_s27 = sshll.u32 %s3713_s23, 4 }
  0x7e   : > { %2938 = vmatpush3.bf16.msra.mxu0 %v3735_v8  ;;  %477 = vperm.xlu0 %3230, %v471_v17   ;;  %v473_v19 = vld [vmem:[%s4108_s3 + $0x10] sm:$0xff]  ;;  %v580_v20 = vld [vmem:[%s4111_s6] sm:$0xff]  ;;  %v581_v21 = vld [vmem:[%s4111_s6 + $0x8] sm:$0xff]  ;;  %v3779_v23 = vpack.c.bf16 %v458_v16, %v457_v15  ;;  %s4149_s19 = sld [smem:[#allocation16_spill]]  ;;  %s448_s28 = scalar_lea.vmem [#allocation9], %s2454_s27 }
  0x7f   : > { %2940 = vmatprep.subr.bf16.mxu0 %v3740_v10  ;;  %487 = vperm.xlu1 %3231, %v473_v19   ;;  %v582_v22 = vld [vmem:[%s4111_s6 + $0x10] sm:$0xff]  ;;  %v474_v24 = vld [vmem:[%s4108_s3 + $0x18] sm:$0xff]  ;;  %v2967_v25 = vpack.c.bf16 %v581_v21, %v580_v20  ;;  %v459_v27 = vld [vmem:[%s4106_s1 + $0x40] sm:$0xff]  ;;  %s2341_s11 = sshll.u32 %s448_s28, 4  ;;  %s2536_s9 = sshll.u32 %s3569_s17, 8  ;;  %s4054_s11 = int_to_ptr.vmem [resolvable:$true] %s2341_s11 }
  0x80   : > { %v583_v26 = vld [vmem:[%s4111_s6 + $0x18] sm:$0xff]  ;;  %v460_v28 = vld [vmem:[%s4106_s1 + $0x48] sm:$0xff]  ;;  %v584_v30 = vld [vmem:[%s4111_s6 + $0x20] sm:$0xff]  ;;  %s4150_s13 = sld [smem:[#allocation19_spill]]  ;;  %s2328_s17 = scalar_lea.sflag [#allocation5], %s3713_s23 }
  0x81   : > { %v2971_v29 = vpack.c.bf16 %v583_v26, %v582_v22  ;;  %2968 = vmatprep.subr.bf16.mxu1 %v2967_v25  ;;  %v585_v31 = vld [vmem:[%s4111_s6 + $0x28] sm:$0xff]  ;;  %v3801_v32 = vpack.c.bf16 %v460_v28, %v459_v27  ;;  %v461_v33 = vld [vmem:[%s4106_s1 + $0x50] sm:$0xff]  ;;  %v462_v34 = vld [vmem:[%s4106_s1 + $0x58] sm:$0xff]  ;;  %s3408_s20 = scalar_lea.vmem %s4054_s11, 256 }
  0x82   : > { %2942 = vmatpush3.bf16.msra.mxu0 %v3740_v10  ;;  %482 = vperm.xlu0 %3230, %v472_v18   ;;  %v2975_v35 = vpack.c.bf16 %v585_v31, %v584_v30  ;;  %v3811_v36 = vpack.c.bf16 %v462_v34, %v461_v33  ;;  %v463_v37 = vld [vmem:[%s4106_s1 + $0x60] sm:$0xff]  ;;  %v464_v38 = vld [vmem:[%s4106_s1 + $0x68] sm:$0xff]  ;;  %v465_v40 = vld [vmem:[%s4106_s1 + $0x70] sm:$0xff]  ;;  %p3409_p8 = scmp.ne.s32.totalorder %s4054_s11, %s3408_s20 }
  0x83   : > { %2944 = vmatprep.subr.bf16.mxu0 %v3751_v13  ;;  %492 = vperm.xlu1 %3231, %v474_v24   ;;  %v3821_v39 = vpack.c.bf16 %v464_v38, %v463_v37  ;;  %v466_v41 = vld [vmem:[%s4106_s1 + $0x78] sm:$0xff]  ;;  %v468_v43 = vld [vmem:[#allocation3 + $0x8] sm:$0xff]  ;;  %v469_v44 = vld [vmem:[#allocation3 + $0x10] sm:$0xff] }
  0x84   : > { %2970 = vmatpush3.bf16.msra.mxu1 %v2967_v25  ;;  %v3831_v42 = vpack.c.bf16 %v466_v41, %v465_v40  ;;  %v470_v45 = vld [vmem:[#allocation3 + $0x18] sm:$0xff]  ;;  %v586_v46 = vld [vmem:[%s4111_s6 + $0x30] sm:$0xff]  ;;  %v695_v49 = vld [vmem:[#allocation6] sm:$0xff]  ;;  %p4152_p9 = scmp.ne.s32.totalorder %s4149_s19, 0 }
  0x85   : > { %2972 = vmatprep.subr.bf16.mxu1 %v2971_v29  ;;  %v587_v47 = vld [vmem:[%s4111_s6 + $0x38] sm:$0xff]  ;;  %v696_v50 = vld [vmem:[#allocation6 + $0x8] sm:$0xff]  ;;  %v697_v55 = vld [vmem:[#allocation6 + $0x10] sm:$0xff] }
  0x86   : > { %2946 = vmatpush3.bf16.msra.mxu0 %v3751_v13  ;;  %v2979_v48 = vpack.c.bf16 %v587_v47, %v586_v46  ;;  %v2983_v51 = vpack.c.bf16 %v696_v50, %v695_v49  ;;  %v698_v56 = vld [vmem:[#allocation6 + $0x18] sm:$0xff]  ;;  %v693_v3 = vld [vmem:[%s3716_s22] sm:$0xff]  ;;  %v694_v4 = vld [vmem:[%s3716_s22 + $0x8] sm:$0xff]  ;;  %s4151_s24 = smov %s4150_s13  ;;  %p3410_p13 = pnand %p3409_p8, %p4152_p9 }
  0x87   : > { %2948 = vmatprep.subr.bf16.mxu0 %v3779_v23  ;;  %v2987_v62 = vpack.c.bf16 %v698_v56, %v697_v55  ;;  %v2455_v5 = vld [vmem:[%s4112_s7] ss:$0 sm:$0xff]  ;;  %vm3855_vm3 = vmpackc.low %vm793_vm2, %vm793_vm2 }
  0x88   : > { %2974 = vmatpush3.bf16.msra.mxu1 %v2971_v29  ;;  %v2460_v20 = vld [vmem:[%s4110_s5] ss:$0 sm:$0xff]  ;;  %p3411_p1 = pneg %p3410_p13 }
  0x89   : > { %2976 = vmatprep.subr.bf16.mxu1 %v2975_v35 }
  0x8a   : > { %2950 = vmatpush3.bf16.msra.mxu0 %v3779_v23 }
  0x8b   : > { %2952 = vmatprep.subr.bf16.mxu0 %v3801_v32 }
  0x8c   : > { %2978 = vmatpush3.bf16.msra.mxu1 %v2975_v35 }
  0x8d   : > { %2980 = vmatprep.subr.bf16.mxu1 %v2979_v48 }
  0x8e   : > { %2954 = vmatpush3.bf16.msra.mxu0 %v3801_v32 }
  0x8f   : > { %2956 = vmatprep.subr.bf16.mxu0 %v3811_v36 }
  0x90   : > { %2982 = vmatpush3.bf16.msra.mxu1 %v2979_v48 }
  0x91   : > { %2984 = vmatprep.subr.bf16.mxu1 %v2983_v51 }
  0x92   : > { %2958 = vmatpush3.bf16.msra.mxu0 %v3811_v36 }
  0x93   : > { %2960 = vmatprep.subr.bf16.mxu0 %v3821_v39 }
  0x96   : > { %2962 = vmatpush3.bf16.msra.mxu0 %v3821_v39 }
  0x97   : > { %2964 = vmatprep.subr.bf16.mxu0 %v3831_v42 }
  0x9a   : > { %2966 = vmatpush3.bf16.msra.mxu0 %v3831_v42 }
  0x9d   : > { %2710 = vmatmul.mubr.f32.vlgmr.msra.gmra.mrb[0].mxu0 %v468_v43 }
  0x9e   : > { %2712 = vmatprep.mubr.f32.mxu0 %v469_v44 }
  0xa1   : > { %2713 = vmatmul.mubr.f32.gmra.mrb[2].mxu0 %v470_v45 }
  0xfd   : > { %v478_v52 = vpop.permute.xlu0 %477 }
  0xfe   : > { %v488_v53 = vpop.permute.xlu1 %487 }
 0x101   : > { %v483_v58 = vpop.permute.xlu0 %482 }
 0x102   : > { %v493_v60 = vpop.permute.xlu1 %492 }
 0x170   : > { %v2711_v54 = vpop.f32.mrb[0].mxu0 }
 0x171   : > { %v561_v57 = vpop.f32.mrb[1].mxu0  ;;  %v567_v61 = vadd.f32 %v2711_v54, %v483_v58 }
 0x172   : > { %v562_v59 = vadd.f32 %v561_v57, %v478_v52 }
 0x174   : > { %v2714_v63 = vpop.f32.mrb[2].mxu0  ;;  %2731 = vmatprep.mubr.msk.f32.mxu1 %vm595_vm0, %v562_v59 }
 0x175   : > { %v571_v0 = vpop.f32.mrb[3].mxu0  ;;  %2732 = vmatmul.mubr.msk.f32.vlgmr.msra.gmra.mrb[0].mxu1 %vm595_vm0, %v567_v61  ;;  %v577_v1 = vadd.f32 %v2714_v63, %v493_v60 }
 0x176   : > { %v572_v2 = vadd.f32 %v571_v0, %v488_v53  ;;  %2986 = vmatpush3.bf16.msra.mxu1 %v2983_v51 }
 0x177   : > { %2988 = vmatprep.subr.bf16.mxu1 %v2987_v62 }
 0x178   : > { %2734 = vmatprep.mubr.msk.f32.mxu1 %vm595_vm0, %v572_v2 }
 0x179   : > { %2735 = vmatmul.mubr.msk.f32.gmra.mrb[2].mxu1 %vm595_vm0, %v577_v1 }
 0x17a   : > { %2990 = vmatpush3.bf16.msra.mxu1 %v2987_v62  ;;  %2745 = vmatprep.mubr.msk.f32.mxu1 %vm706_vm1, %v693_v3 }
 0x17d   : > { %2746 = vmatmul.mubr.msk.f32.vlgmr.msra.gmra.mrb[4].mxu1 %vm706_vm1, %v694_v4 }
 0x248   : > { %v2733_v6 = vpop.f32.mrb[0].mxu1 }
 0x249   : > { %v680_v7 = vadd.f32 %v2733_v6, %v2455_v5  ;;  %v674_v9 = vpop.f32.mrb[1].mxu1 }
 0x24a   : > { %v675_v11 = vadd.f32 %v2455_v5, %v674_v9 }
 0x24c   : > { %v2736_v14 = vpop.f32.mrb[2].mxu1  ;;  %v3859_v15 = vpack.i.bf16 %v680_v7, %v675_v11  ;;  %v2991_v16 = vpack.c.bf16 %v680_v7, %v675_v11  ;;  %v2485_v7 = vld [vmem:[%s4108_s3 + $0x28] sm:$0xff]  ;;  %v2487_v11 = vld [vmem:[%s4108_s3 + $0x38] sm:$0xff] }
 0x24d   : > { %v690_v17 = vadd.f32 %v2736_v14, %v2455_v5  ;;  %v684_v18 = vpop.f32.mrb[3].mxu1 }
 0x24e   : > { %v685_v19 = vadd.f32 %v2455_v5, %v684_v18  ;;  %3233 = vrot.lane.b32.xlu0 %v3859_v15, %s3486_s29  ;;  %2993 = vmatprep.subr.msk.bf16.mxu1 %vm3855_vm3, %v2991_v16  ;;  %v2484_v5 = vld [vmem:[%s4108_s3 + $0x20] sm:$0xff] }
 0x24f   : > { %2996 = vmatpush3.bf16.xpose.msk.msra.mxu1 %vm3855_vm3, %v2991_v16  ;;  %v789_v16 = vld [vmem:[#allocation8 + $0x8] sm:$0xff] }
 0x250   : > { %v3870_v21 = vpack.i.bf16 %v690_v17, %v685_v19  ;;  %v2997_v22 = vpack.c.bf16 %v690_v17, %v685_v19  ;;  %v2747_v24 = vpop.f32.mrb[4].mxu1 }
 0x251   : > { %v779_v25 = vpop.f32.mrb[5].mxu1  ;;  %v785_v26 = vadd.f32 %v2747_v24, %v2460_v20 }
 0x252   : > { %3238 = vrot.lane.b32.xlu1 %v3870_v21, %s3486_s29  ;;  %2999 = vmatprep.subr.msk.bf16.mxu1 %vm3855_vm3, %v2997_v22  ;;  %v780_v27 = vadd.f32 %v2460_v20, %v779_v25 }
 0x254   : > { %2756 = vmatprep.mubr.msk.f32.mxu1 %vm793_vm2, %v780_v27  ;;  %1091 = vrot.lane.b32.xlu0 %v780_v27, %s3486_s29 }
 0x256   : > { %1093 = vrot.lane.b32.xlu1 %v785_v26, %s3486_s29 }
 0x257   : > { %3002 = vmatpush3.bf16.xpose.msk.msra.mxu1 %vm3855_vm3, %v2997_v22 }
 0x25e   : > { %2757 = vmatmul.mubr.msk.f32.vlgmr.msra.gmra.mrb[6].mxu1 %vm793_vm2, %v785_v26 }
 0x2c0   : > { %v3234_v28 = vpop.permute.xlu0 %3233 }
 0x2c1   : > { %v3236_v29 = vunpack.i.h.bf16 %v3234_v28  ;;  %v3235_v30 = vunpack.i.l.bf16 %v3234_v28 }
 0x2c3   : > { %v3015_v31 = vpack.c.bf16 %v3236_v29, %v3235_v30 }
 0x2c4   : > { %v3239_v33 = vpop.permute.xlu1 %3238 }
 0x2c5   : > { %v3241_v34 = vunpack.i.h.bf16 %v3239_v33  ;;  %v3240_v35 = vunpack.i.l.bf16 %v3239_v33  ;;  %3017 = vmatprep.subr.msk.bf16.mxu1 %vm3855_vm3, %v3015_v31  ;;  %v2486_v33 = vld [vmem:[%s4108_s3 + $0x30] sm:$0xff] }
 0x2c6   : > { %3020 = vmatpush3.bf16.xpose.msk.msra.mxu1 %vm3855_vm3, %v3015_v31  ;;  %v1092_v37 = vpop.permute.xlu0 %1091 }
 0x2c7   : > { %v3021_v38 = vpack.c.bf16 %v3241_v34, %v3240_v35  ;;  %2785 = vmatprep.mubr.msk.f32.mxu1 %vm793_vm2, %v1092_v37 }
 0x2c8   : > { %v1094_v40 = vpop.permute.xlu1 %1093 }
 0x2c9   : > { %3023 = vmatprep.subr.msk.bf16.mxu1 %vm3855_vm3, %v3021_v38 }
 0x2ce   : > { %3026 = vmatpush3.bf16.xpose.msk.msra.mxu1 %vm3855_vm3, %v3021_v38 }
 0x2d5   : > { %2786 = vmatmul.mubr.msk.f32.vlgmr.msra.gmra.mrb[8].mxu1 %vm793_vm2, %v1094_v40 }
 0x331   : > { %v2758_v41 = vpop.f32.mrb[6].mxu1 }
 0x332   : > { %v878_v43 = vpop.f32.mrb[7].mxu1  ;;  %v890_v44 = vsel %vm706_vm1, %v2758_v41, -inf }
 0x333   : > { %891 = vmax.xlane.f32.xlu1 %v890_v44  ;;  %v887_v45 = vsel %vm706_vm1, %v878_v43, -inf }
 0x334   : > { %888 = vmax.xlane.f32.xlu0 %v887_v45 }
 0x344   : > { %3243 = vrot.lane.b32.xlu1 %v3859_v15, %s3487_s21 }
 0x3a8   : > { %v3896_v46 = vpop.f32.mrb[8].mxu1 }
 0x3a9   : > { %v1181_v47 = vpop.f32.mrb[9].mxu1  ;;  %v1193_v63 = vsel %vm706_vm1, %v3896_v46, -inf }
 0x3aa   : > { %v1190_v48 = vsel %vm706_vm1, %v1181_v47, -inf }
 0x3ab   : > { %1191 = vmax.xlane.f32.xlu1 %v1190_v48 }
 0x3c0   : > { %v892_v49 = vpop.xlane.xlu1 %891 }
 0x3c1   : > { %v894_v50 = vsub.f32 %v2758_v41, %v892_v49  ;;  %v889_v51 = vpop.xlane.xlu0 %888  ;;  %v790_v49 = vld [vmem:[#allocation8 + $0x10] sm:$0xff] }
 0x3c2   : > { %v893_v52 = vsub.f32 %v878_v43, %v889_v51 }
 0x3c3   : > { %v897_v53 = vmul.f32 1.442695, %v894_v50  ;;  %v791_v50 = vld [vmem:[#allocation8 + $0x18] sm:$0xff] }
 0x3c4   : > { %v895_v54 = vmul.f32 1.442695, %v893_v52  ;;  %v3244_v55 = vpop.permute.xlu1 %3243  ;;  %v3035_v52 = vpack.c.bf16 %v791_v50, %v790_v49 }
 0x3c5   : > { %3292 = vpow2.f32 %v897_v53  ;;  %v3246_v56 = vunpack.i.h.bf16 %v3244_v55  ;;  %v3245_v57 = vunpack.i.l.bf16 %v3244_v55 }
 0x3c6   : > { %3294 = vpow2.f32 %v895_v54 }
 0x3c7   : > { %v3003_v58 = vpack.c.bf16 %v3246_v56, %v3245_v57  ;;  %v1389_v57 = vld [vmem:[#allocation3 + $0x20] sm:$0xff] }
 0x3c9   : > { %3004 = vmatprep.subr.bf16.mxu0 %v3003_v58 }
 0x3ca   : > { %3006 = vmatpush3.bf16.msra.mxu0 %v3003_v58 }
 0x3cf   : > { %v3293_v59 = vpop.eup %3292 }
 0x3d0   : > { %v902_v60 = vsel %vm706_vm1, %v3293_v59, 0.0  ;;  %v3295_v61 = vpop.eup %3294 }
 0x3d1   : > { %903 = vadd.xlane.f32.xlu0 %v902_v60  ;;  %v899_v62 = vsel %vm706_vm1, %v3295_v61, 0.0  ;;  %v2493_v60 = vld [vmem:[%s4111_s6 + $0x68] sm:$0xff] }
 0x3d5   : > { %900 = vadd.xlane.f32.xlu0 %v899_v62  ;;  %v2494_v62 = vld [vmem:[%s4111_s6 + $0x70] sm:$0xff] }
 0x3eb   : > { %3248 = vrot.lane.b32.xlu0 %v3870_v21, %s3487_s21 }
 0x40a   : > { %1194 = vmax.xlane.f32.xlu0 %v1193_v63  ;;  %v2495_v63 = vld [vmem:[%s4111_s6 + $0x78] sm:$0xff] }
 0x438   : > { %v1192_v0 = vpop.xlane.xlu1 %1191 }
 0x439   : > { %v1196_v1 = vsub.f32 %v1181_v47, %v1192_v0  ;;  %v3083_v0 = vpack.c.bf16 %v2495_v63, %v2494_v62 }
 0x43b   : > { %v1198_v2 = vmul.f32 1.442695, %v1196_v1  ;;  %v1621_v1 = vld [vmem:[#allocation6 + $0x20] sm:$0xff] }
 0x43d   : > { %3296 = vpow2.f32 %v1198_v2  ;;  %v1622_v2 = vld [vmem:[#allocation6 + $0x28] sm:$0xff] }
 0x447   : > { %v3297_v3 = vpop.eup %3296 }
 0x448   : > { %v1202_v4 = vsel %vm706_vm1, %v3297_v3, 0.0 }
 0x449   : > { %1203 = vadd.xlane.f32.xlu1 %v1202_v4 }
 0x45a   : > { %3253 = vrot.lane.b32.xlu1 %v3859_v15, %s3488_s18  ;;  %v788_v15 = vld [vmem:[#allocation8] sm:$0xff] }
 0x45b   : > { %v3011_v20 = vpack.c.bf16 %v789_v16, %v788_v15 }
 0x45e   : > { %1400 = vperm.xlu1 %3231, %v2484_v5   ;;  %v904_v6 = vpop.xlane.xlu0 %903 }
 0x45f   : > { %3298 = vrcp.f32 %v904_v6 }
 0x462   : > { %1405 = vperm.xlu1 %3231, %v2485_v7   ;;  %v901_v9 = vpop.xlane.xlu0 %900 }
 0x463   : > { %3300 = vrcp.f32 %v901_v9 }
 0x466   : > { %1415 = vperm.xlu1 %3231, %v2487_v11   ;;  %v3249_v14 = vpop.permute.xlu0 %3248  ;;  %v1623_v11 = vld [vmem:[#allocation6 + $0x30] sm:$0xff] }
 0x467   : > { %v3251_v17 = vunpack.i.h.bf16 %v3249_v14  ;;  %v3250_v18 = vunpack.i.l.bf16 %v3249_v14  ;;  %v1624_v14 = vld [vmem:[#allocation6 + $0x38] sm:$0xff] }
 0x469   : > { %v3007_v19 = vpack.c.bf16 %v3251_v17, %v3250_v18  ;;  %v3299_v22 = vpop.eup %3298  ;;  %v3091_v18 = vpack.c.bf16 %v1624_v14, %v1623_v11 }
 0x46a   : > { %v908_v26 = vmul.f32 %v3299_v22, %v3293_v59  ;;  %v2492_v59 = vld [vmem:[%s4111_s6 + $0x60] sm:$0xff] }
 0x46b   : > { %3008 = vmatprep.subr.bf16.mxu0 %v3007_v19 }
 0x46c   : > { %3010 = vmatpush3.bf16.msra.mxu0 %v3007_v19 }
 0x46d   : > { %v3301_v24 = vpop.eup %3300  ;;  %3012 = vmatprep.subr.bf16.mxu0 %v3011_v20 }
 0x46e   : > { %v907_v25 = vmul.f32 %v3301_v24, %v3295_v61  ;;  %v3079_v61 = vpack.c.bf16 %v2493_v60, %v2492_v59 }
 0x470   : > { %2767 = vmatprep.mubr.msk.f32.mxu0 %vm706_vm1, %v907_v25 }
 0x471   : > { %2768 = vmatmul.mubr.msk.f32.vlgmr.msra.gmra.mrb[4].mxu0 %vm706_vm1, %v908_v26 }
 0x472   : > { %3014 = vmatpush3.bf16.msra.mxu0 %v3011_v20 }
 0x497   : > { %v1195_v27 = vpop.xlane.xlu0 %1194 }
 0x498   : > { %v1197_v28 = vsub.f32 %v3896_v46, %v1195_v27  ;;  %v2502_v27 = vld [vmem:[%s3716_s22 + $0x10] sm:$0xff] }
 0x49a   : > { %v1200_v29 = vmul.f32 1.442695, %v1197_v28  ;;  %v2503_v28 = vld [vmem:[%s3716_s22 + $0x18] sm:$0xff]  ;;  %s4060_s22 = scalar_lea.hbm %s4150_s13, %s2536_s9 }
 0x49c   : > { %3302 = vpow2.f32 %v1200_v29  ;;  %v2497_v29 = vld [vmem:[%s4112_s7 + $0x1] ss:$0 sm:$0xff] }
 0x4a6   : > { %v3303_v30 = vpop.eup %3302 }
 0x4a7   : > { %v1205_v31 = vsel %vm706_vm1, %v3303_v30, 0.0 }
 0x4a8   : > { %1206 = vadd.xlane.f32.xlu0 %v1205_v31 }
 0x4be   : > { %3258 = vrot.lane.b32.xlu0 %v3870_v21, %s3488_s18 }
 0x4c2   : > { %1410 = vperm.xlu0 %3230, %v2486_v33  }
 0x4d6   : > { %v1204_v34 = vpop.xlane.xlu1 %1203 }
 0x4d7   : > { %3304 = vrcp.f32 %v1204_v34 }
 0x4da   : > { %v3254_v35 = vpop.permute.xlu1 %3253 }
 0x4db   : > { %v3256_v37 = vunpack.i.h.bf16 %v3254_v35  ;;  %v3255_v38 = vunpack.i.l.bf16 %v3254_v35 }
 0x4dd   : > { %v3027_v40 = vpack.c.bf16 %v3256_v37, %v3255_v38 }
 0x4de   : > { %v1401_v6 = vpop.permute.xlu1 %1400 }
 0x4df   : > { %3028 = vmatprep.subr.bf16.mxu0 %v3027_v40 }
 0x4e1   : > { %v3305_v44 = vpop.eup %3304 }
 0x4e2   : > { %v1210_v48 = vmul.f32 %v3305_v44, %v3297_v3  ;;  %v3087_v3 = vpack.c.bf16 %v1622_v2, %v1621_v1  ;;  %v1406_v7 = vpop.permute.xlu1 %1405  ;;  %v2505_v44 = vld [vmem:[%s4110_s5 + $0x1] ss:$0 sm:$0xff] }
 0x4e6   : > { %v1416_v24 = vpop.permute.xlu1 %1415 }
 0x535   : > { %v1207_v41 = vpop.xlane.xlu0 %1206 }
 0x536   : > { %3306 = vrcp.f32 %v1207_v41 }
 0x539   : > { %v3259_v43 = vpop.permute.xlu0 %3258 }
 0x53a   : > { %v3261_v45 = vunpack.i.h.bf16 %v3259_v43  ;;  %v3260_v46 = vunpack.i.l.bf16 %v3259_v43 }
 0x53c   : > { %v3031_v51 = vpack.c.bf16 %v3261_v45, %v3260_v46 }
 0x540   : > { %v3307_v53 = vpop.eup %3306 }
 0x541   : > { %v1211_v54 = vmul.f32 %v3307_v53, %v3303_v30  ;;  %v1411_v20 = vpop.permute.xlu0 %1410 }
 0x544   : > { %v2769_v47 = vpop.f32.mrb[4].mxu0 }
 0x545   : > { %v993_v21 = vpop.f32.mrb[5].mxu0 }
 0x546   : > { %2774 = vmatprep.mubr.msk.f32.mxu0 %vm793_vm2, %v993_v21 }
 0x547   : > { %2775 = vmatmul.mubr.msk.f32.vlgmr.msra.gmra.mrb[6].mxu0 %vm793_vm2, %v2769_v47 }
 0x548   : > { %3030 = vmatpush3.bf16.msra.mxu0 %v3027_v40  ;;  %2796 = vmatprep.mubr.msk.f32.mxu0 %vm706_vm1, %v1210_v48 }
 0x549   : > { %3032 = vmatprep.subr.bf16.mxu0 %v3031_v51 }
 0x54c   : > { %3034 = vmatpush3.bf16.msra.mxu0 %v3031_v51 }
 0x54d   : > { %3036 = vmatprep.subr.bf16.mxu0 %v3035_v52 }
 0x54f   : > { %2797 = vmatmul.mubr.msk.f32.vlgmr.msra.gmra.mrb[8].mxu0 %vm706_vm1, %v1211_v54 }
 0x550   : > { %3038 = vmatpush3.bf16.msra.mxu0 %v3035_v52 }
 0x551   : > { %3040 = vmatprep.subr.bf16.mxu0 %v3735_v8 }
 0x622   : > { %v2798_v55 = vpop.f32.mrb[8].mxu0 }
 0x623   : > { %v1296_v56 = vpop.f32.mrb[9].mxu0 }
 0x624   : > { %2803 = vmatprep.mubr.msk.f32.mxu0 %vm793_vm2, %v1296_v56 }
 0x625   : > { %2804 = vmatmul.mubr.msk.f32.vlgmr.msra.gmra.mrb[6].mxu0 %vm793_vm2, %v2798_v55 }
 0x626   : > { %3042 = vmatpush3.bf16.msra.mxu0 %v3735_v8  ;;  %2838 = vmatprep.mubr.f32.mxu0 %v1389_v57  ;;  %v1390_v8 = vld [vmem:[#allocation3 + $0x28] sm:$0xff] }
 0x627   : > { %3044 = vmatprep.subr.bf16.mxu0 %v3740_v10 }
 0x62a   : > { %3046 = vmatpush3.bf16.msra.mxu0 %v3740_v10  ;;  %v1391_v10 = vld [vmem:[#allocation3 + $0x30] sm:$0xff] }
 0x62b   : > { %3048 = vmatprep.subr.bf16.mxu0 %v3751_v13 }
 0x62e   : > { %3050 = vmatpush3.bf16.msra.mxu0 %v3751_v13  ;;  %v1392_v13 = vld [vmem:[#allocation3 + $0x38] sm:$0xff] }
 0x62f   : > { %3052 = vmatprep.subr.bf16.mxu0 %v3779_v23 }
 0x632   : > { %3054 = vmatpush3.bf16.msra.mxu0 %v3779_v23  ;;  %v2488_v23 = vld [vmem:[%s4111_s6 + $0x40] sm:$0xff] }
 0x633   : > { %3056 = vmatprep.subr.bf16.mxu0 %v3801_v32 }
 0x636   : > { %3058 = vmatpush3.bf16.msra.mxu0 %v3801_v32  ;;  %v2489_v32 = vld [vmem:[%s4111_s6 + $0x48] sm:$0xff] }
 0x637   : > { %3060 = vmatprep.subr.bf16.mxu0 %v3811_v36 }
 0x63a   : > { %3062 = vmatpush3.bf16.msra.mxu0 %v3811_v36  ;;  %v2490_v36 = vld [vmem:[%s4111_s6 + $0x50] sm:$0xff] }
 0x63b   : > { %3064 = vmatprep.subr.bf16.mxu0 %v3821_v39 }
 0x63e   : > { %3066 = vmatpush3.bf16.msra.mxu0 %v3821_v39  ;;  %v3071_v39 = vpack.c.bf16 %v2489_v32, %v2488_v23 }
 0x63f   : > { %3068 = vmatprep.subr.bf16.mxu0 %v3831_v42 }
 0x640   : > { %3072 = vmatprep.subr.bf16.mxu1 %v3071_v39 }
 0x641   : > { %3074 = vmatpush3.bf16.msra.mxu1 %v3071_v39 }
 0x642   : > { %3070 = vmatpush3.bf16.msra.mxu0 %v3831_v42  ;;  %v2491_v42 = vld [vmem:[%s4111_s6 + $0x58] sm:$0xff] }
 0x643   : > { %v3075_v58 = vpack.c.bf16 %v2491_v42, %v2490_v36 }
 0x645   : > { %2839 = vmatmul.mubr.f32.vlgmr.msra.gmra.mrb[10].mxu0 %v1390_v8  ;;  %3076 = vmatprep.subr.bf16.mxu1 %v3075_v58 }
 0x646   : > { %2841 = vmatprep.mubr.f32.mxu0 %v1391_v10  ;;  %3078 = vmatpush3.bf16.msra.mxu1 %v3075_v58 }
 0x647   : > { %3080 = vmatprep.subr.bf16.mxu1 %v3079_v61 }
 0x649   : > { %2842 = vmatmul.mubr.f32.gmra.mrb[12].mxu0 %v1392_v13 }
 0x64a   : > { %3082 = vmatpush3.bf16.msra.mxu1 %v3079_v61 }
 0x64b   : > { %3084 = vmatprep.subr.bf16.mxu1 %v3083_v0 }
 0x64e   : > { %3086 = vmatpush3.bf16.msra.mxu1 %v3083_v0 }
 0x64f   : > { %3088 = vmatprep.subr.bf16.mxu1 %v3087_v3 }
 0x6f8   : > { %v3972_v4 = vpop.f32.mrb[6].mxu0 }
 0x6f9   : > { %v3974_v5 = vpop.f32.mrb[7].mxu0 }
 0x718   : > { %v2840_v9 = vpop.f32.mrb[10].mxu0 }
 0x719   : > { %v1484_v15 = vpop.f32.mrb[11].mxu0  ;;  %v1490_v17 = vadd.f32 %v2840_v9, %v1406_v7 }
 0x71a   : > { %v1485_v16 = vadd.f32 %v1484_v15, %v1401_v6 }
 0x71c   : > { %v2843_v19 = vpop.f32.mrb[12].mxu0  ;;  %2860 = vmatprep.mubr.msk.f32.mxu1 %vm595_vm0, %v1485_v16 }
 0x71d   : > { %v1494_v22 = vpop.f32.mrb[13].mxu0  ;;  %2861 = vmatmul.mubr.msk.f32.vlgmr.msra.gmra.mrb[10].mxu1 %vm595_vm0, %v1490_v17  ;;  %v1500_v26 = vadd.f32 %v2843_v19, %v1416_v24 }
 0x71e   : > { %v1495_v25 = vadd.f32 %v1494_v22, %v1411_v20  ;;  %3090 = vmatpush3.bf16.msra.mxu1 %v3087_v3 }
 0x71f   : > { %3092 = vmatprep.subr.bf16.mxu1 %v3091_v18 }
 0x720   : > { %2863 = vmatprep.mubr.msk.f32.mxu1 %vm595_vm0, %v1495_v25  ;;  %v1715_v25 = vld [vmem:[#allocation8 + $0x20] sm:$0xff] }
 0x721   : > { %2864 = vmatmul.mubr.msk.f32.gmra.mrb[12].mxu1 %vm595_vm0, %v1500_v26  ;;  %v1716_v26 = vld [vmem:[#allocation8 + $0x28] sm:$0xff] }
 0x722   : > { %3094 = vmatpush3.bf16.msra.mxu1 %v3091_v18  ;;  %2874 = vmatprep.mubr.msk.f32.mxu1 %vm706_vm1, %v2502_v27 }
 0x725   : > { %2875 = vmatmul.mubr.msk.f32.vlgmr.msra.gmra.mrb[14].mxu1 %vm706_vm1, %v2503_v28 }
 0x7f0   : > { %v2862_v30 = vpop.f32.mrb[10].mxu1 }
 0x7f1   : > { %v1604_v31 = vadd.f32 %v2862_v30, %v2497_v29  ;;  %v1598_v33 = vpop.f32.mrb[11].mxu1  ;;  %v3115_v30 = vpack.c.bf16 %v1716_v26, %v1715_v25 }
 0x7f2   : > { %v1599_v34 = vadd.f32 %v2497_v29, %v1598_v33 }
 0x7f4   : > { %v2865_v35 = vpop.f32.mrb[12].mxu1  ;;  %v3987_v37 = vpack.i.bf16 %v1604_v31, %v1599_v34  ;;  %v3095_v38 = vpack.c.bf16 %v1604_v31, %v1599_v34 }
 0x7f5   : > { %v1614_v40 = vadd.f32 %v2865_v35, %v2497_v29  ;;  %v1608_v41 = vpop.f32.mrb[13].mxu1 }
 0x7f6   : > { %v1609_v43 = vadd.f32 %v2497_v29, %v1608_v41  ;;  %3263 = vrot.lane.b32.xlu0 %v3987_v37, %s3486_s29  ;;  %3097 = vmatprep.subr.msk.bf16.mxu1 %vm3855_vm3, %v3095_v38 }
 0x7f7   : > { %3100 = vmatpush3.bf16.xpose.msk.msra.mxu1 %vm3855_vm3, %v3095_v38 }
 0x7f8   : > { %v3998_v45 = vpack.i.bf16 %v1614_v40, %v1609_v43  ;;  %v3101_v46 = vpack.c.bf16 %v1614_v40, %v1609_v43  ;;  %v2876_v47 = vpop.f32.mrb[14].mxu1 }
 0x7f9   : > { %v1705_v21 = vpop.f32.mrb[15].mxu1  ;;  %v1711_v48 = vadd.f32 %v2876_v47, %v2505_v44 }
 0x7fa   : > { %3268 = vrot.lane.b32.xlu1 %v3998_v45, %s3486_s29  ;;  %3103 = vmatprep.subr.msk.bf16.mxu1 %vm3855_vm3, %v3101_v46  ;;  %v1706_v49 = vadd.f32 %v2505_v44, %v1705_v21 }
 0x7fc   : > { %2885 = vmatprep.mubr.msk.f32.mxu1 %vm793_vm2, %v1706_v49  ;;  %2018 = vrot.lane.b32.xlu0 %v1706_v49, %s3486_s29 }
 0x7fe   : > { %2020 = vrot.lane.b32.xlu1 %v1711_v48, %s3486_s29  ;;  %s3490_s29 = smov [#allocation9]  }
 0x7ff   : > { %3106 = vmatpush3.bf16.xpose.msk.msra.mxu1 %vm3855_vm3, %v3101_v46 }
 0x806   : > { %2886 = vmatmul.mubr.msk.f32.vlgmr.msra.gmra.mrb[16].mxu1 %vm793_vm2, %v1711_v48 }
 0x868   : > { %v3264_v50 = vpop.permute.xlu0 %3263 }
 0x869   : > { %v3266_v51 = vunpack.i.h.bf16 %v3264_v50  ;;  %v3265_v52 = vunpack.i.l.bf16 %v3264_v50 }
 0x86b   : > { %v3119_v53 = vpack.c.bf16 %v3266_v51, %v3265_v52 }
 0x86c   : > { %v3269_v54 = vpop.permute.xlu1 %3268 }
 0x86d   : > { %v3271_v55 = vunpack.i.h.bf16 %v3269_v54  ;;  %v3270_v56 = vunpack.i.l.bf16 %v3269_v54  ;;  %3121 = vmatprep.subr.msk.bf16.mxu1 %vm3855_vm3, %v3119_v53 }
 0x86e   : > { %3124 = vmatpush3.bf16.xpose.msk.msra.mxu1 %vm3855_vm3, %v3119_v53  ;;  %v2019_v57 = vpop.permute.xlu0 %2018 }
 0x86f   : > { %v3125_v8 = vpack.c.bf16 %v3271_v55, %v3270_v56  ;;  %2914 = vmatprep.mubr.msk.f32.mxu1 %vm793_vm2, %v2019_v57  ;;  %v1717_v57 = vld [vmem:[#allocation8 + $0x30] sm:$0xff] }
 0x870   : > { %v2021_v10 = vpop.permute.xlu1 %2020 }
 0x871   : > { %3127 = vmatprep.subr.msk.bf16.mxu1 %vm3855_vm3, %v3125_v8 }
 0x876   : > { %3130 = vmatpush3.bf16.xpose.msk.msra.mxu1 %vm3855_vm3, %v3125_v8 }
 0x87d   : > { %2915 = vmatmul.mubr.msk.f32.vlgmr.msra.gmra.mrb[18].mxu1 %vm793_vm2, %v2021_v10 }
 0x8d9   : > { %v2887_v13 = vpop.f32.mrb[16].mxu1 }
 0x8da   : > { %v1805_v23 = vpop.f32.mrb[17].mxu1  ;;  %v1817_v32 = vsel %vm706_vm1, %v2887_v13, -inf }
 0x8db   : > { %1818 = vmax.xlane.f32.xlu1 %v1817_v32  ;;  %v1814_v36 = vsel %vm706_vm1, %v1805_v23, -inf }
 0x8dc   : > { %1815 = vmax.xlane.f32.xlu0 %v1814_v36 }
 0x8ec   : > { %3273 = vrot.lane.b32.xlu1 %v3987_v37, %s3487_s21 }
 0x950   : > { %v2916_v39 = vpop.f32.mrb[18].mxu1 }
 0x951   : > { %v2108_v42 = vpop.f32.mrb[19].mxu1  ;;  %v2120_v14 = vsel %vm706_vm1, %v2916_v39, -inf }
 0x952   : > { %v2117_v58 = vsel %vm706_vm1, %v2108_v42, -inf }
 0x953   : > { %2118 = vmax.xlane.f32.xlu1 %v2117_v58 }
 0x968   : > { %v1819_v12 = vpop.xlane.xlu1 %1818 }
 0x969   : > { %v1821_v59 = vsub.f32 %v2887_v13, %v1819_v12  ;;  %v1816_v60 = vpop.xlane.xlu0 %1815 }
 0x96a   : > { %v1820_v61 = vsub.f32 %v1805_v23, %v1816_v60 }
 0x96b   : > { %v1824_v62 = vmul.f32 1.442695, %v1821_v59 }
 0x96c   : > { %v1822_v63 = vmul.f32 1.442695, %v1820_v61  ;;  %v3274_v0 = vpop.permute.xlu1 %3273 }
 0x96d   : > { %3308 = vpow2.f32 %v1824_v62  ;;  %v3276_v1 = vunpack.i.h.bf16 %v3274_v0  ;;  %v3275_v2 = vunpack.i.l.bf16 %v3274_v0 }
 0x96e   : > { %3310 = vpow2.f32 %v1822_v63 }
 0x96f   : > { %v3107_v3 = vpack.c.bf16 %v3276_v1, %v3275_v2 }
 0x971   : > { %3108 = vmatprep.subr.bf16.mxu0 %v3107_v3 }
 0x972   : > { %3110 = vmatpush3.bf16.msra.mxu0 %v3107_v3 }
 0x977   : > { %v3309_v6 = vpop.eup %3308 }
 0x978   : > { %v1829_v7 = vsel %vm706_vm1, %v3309_v6, 0.0  ;;  %v3311_v9 = vpop.eup %3310 }
 0x979   : > { %1830 = vadd.xlane.f32.xlu0 %v1829_v7  ;;  %v1826_v11 = vsel %vm706_vm1, %v3311_v9, 0.0 }
 0x97d   : > { %1827 = vadd.xlane.f32.xlu0 %v1826_v11 }
 0x993   : > { %3278 = vrot.lane.b32.xlu0 %v3998_v45, %s3487_s21  ;;  %s3412_s21 = sshll.u32 %s3490_s29, 4  ;;  %s3413_s21 = int_to_ptr.vmem [resolvable:$false] %s3412_s21 }
 0x994   : > { %p3415_p3 = scmp.lt.s32.totalorder %s4054_s11, %s3413_s21 }
 0x9b2   : > { %2121 = vmax.xlane.f32.xlu0 %v2120_v14 }
 0x9e0   : > { %v2119_v15 = vpop.xlane.xlu1 %2118 }
 0x9e1   : > { %v2123_v16 = vsub.f32 %v2108_v42, %v2119_v15 }
 0x9e3   : > { %v2125_v17 = vmul.f32 1.442695, %v2123_v16 }
 0x9e5   : > { %3312 = vpow2.f32 %v2125_v17 }
 0x9ef   : > { %v3313_v18 = vpop.eup %3312 }
 0x9f0   : > { %v2129_v19 = vsel %vm706_vm1, %v3313_v18, 0.0 }
 0x9f1   : > { %2130 = vadd.xlane.f32.xlu1 %v2129_v19 }
 0xa02   : > { %3283 = vrot.lane.b32.xlu1 %v3987_v37, %s3488_s18 }
 0xa06   : > { %v1831_v20 = vpop.xlane.xlu0 %1830 }
 0xa07   : > { %3314 = vrcp.f32 %v1831_v20 }
 0xa0a   : > { %v1828_v22 = vpop.xlane.xlu0 %1827 }
 0xa0b   : > { %3316 = vrcp.f32 %v1828_v22 }
 0xa0e   : > { %v3279_v24 = vpop.permute.xlu0 %3278 }
 0xa0f   : > { %v3281_v27 = vunpack.i.h.bf16 %v3279_v24  ;;  %v3280_v28 = vunpack.i.l.bf16 %v3279_v24 }
 0xa11   : > { %v3111_v29 = vpack.c.bf16 %v3281_v27, %v3280_v28  ;;  %v3315_v31 = vpop.eup %3314 }
 0xa12   : > { %v1835_v35 = vmul.f32 %v3315_v31, %v3309_v6 }
 0xa13   : > { %3112 = vmatprep.subr.bf16.mxu0 %v3111_v29 }
 0xa14   : > { %3114 = vmatpush3.bf16.msra.mxu0 %v3111_v29 }
 0xa15   : > { %v3317_v33 = vpop.eup %3316  ;;  %3116 = vmatprep.subr.bf16.mxu0 %v3115_v30 }
 0xa16   : > { %v1834_v34 = vmul.f32 %v3317_v33, %v3311_v9 }
 0xa18   : > { %2896 = vmatprep.mubr.msk.f32.mxu0 %vm706_vm1, %v1834_v34 }
 0xa19   : > { %2897 = vmatmul.mubr.msk.f32.vlgmr.msra.gmra.mrb[14].mxu0 %vm706_vm1, %v1835_v35 }
 0xa1a   : > { %3118 = vmatpush3.bf16.msra.mxu0 %v3115_v30 }
 0xa3f   : > { %v2122_v37 = vpop.xlane.xlu0 %2121 }
 0xa40   : > { %v2124_v38 = vsub.f32 %v2916_v39, %v2122_v37 }
 0xa42   : > { %v2127_v40 = vmul.f32 1.442695, %v2124_v38 }
 0xa44   : > { %3318 = vpow2.f32 %v2127_v40 }
 0xa4e   : > { %v3319_v41 = vpop.eup %3318 }
 0xa4f   : > { %v2132_v43 = vsel %vm706_vm1, %v3319_v41, 0.0 }
 0xa50   : > { %2133 = vadd.xlane.f32.xlu0 %v2132_v43 }
 0xa66   : > { %3288 = vrot.lane.b32.xlu0 %v3998_v45, %s3488_s18  ;;  %v1718_v45 = vld [vmem:[#allocation8 + $0x38] sm:$0xff]  ;;  %s4148_s18 = sld [smem:[#allocation18_spill]] }
 0xa67   : > { %v3139_v10 = vpack.c.bf16 %v1718_v45, %v1717_v57 }
 0xa6c   : > { %v2519_v39 = vld [vmem:[%s4148_s18 + $0x1] ss:$0 sm:$0xff]  ;;  %v2473_v60 = vld [vmem:[%s4148_s18] ss:$0 sm:$0xff] }
 0xa6d   : > { %v3144_v61 = vadd.f32 %v2473_v60, %v3974_v5  ;;  %v3143_v0 = vadd.f32 %v3972_v4, %v2473_v60 }
 0xa7e   : > { %v2131_v44 = vpop.xlane.xlu1 %2130 }
 0xa7f   : > { %3320 = vrcp.f32 %v2131_v44 }
 0xa82   : > { %v3284_v46 = vpop.permute.xlu1 %3283 }
 0xa83   : > { %v3286_v47 = vunpack.i.h.bf16 %v3284_v46  ;;  %v3285_v21 = vunpack.i.l.bf16 %v3284_v46 }
 0xa85   : > { %v3131_v48 = vpack.c.bf16 %v3286_v47, %v3285_v21 }
 0xa87   : > { %3132 = vmatprep.subr.bf16.mxu0 %v3131_v48 }
 0xa89   : > { %v3321_v51 = vpop.eup %3320 }
 0xa8a   : > { %v2137_v56 = vmul.f32 %v3321_v51, %v3313_v18 }
 0xadd   : > { %v2134_v49 = vpop.xlane.xlu0 %2133 }
 0xade   : > { %3322 = vrcp.f32 %v2134_v49 }
 0xae1   : > { %v3289_v50 = vpop.permute.xlu0 %3288 }
 0xae2   : > { %v3291_v52 = vunpack.i.h.bf16 %v3289_v50  ;;  %v3290_v53 = vunpack.i.l.bf16 %v3289_v50 }
 0xae4   : > { %v3135_v8 = vpack.c.bf16 %v3291_v52, %v3290_v53 }
 0xae8   : > { %v3323_v13 = vpop.eup %3322 }
 0xae9   : > { %v2138_v23 = vmul.f32 %v3323_v13, %v3319_v41 }
 0xaec   : > { %v2898_v54 = vpop.f32.mrb[14].mxu0 }
 0xaed   : > { %v1920_v55 = vpop.f32.mrb[15].mxu0 }
 0xaee   : > { %2903 = vmatprep.mubr.msk.f32.mxu0 %vm793_vm2, %v1920_v55 }
 0xaef   : > { %2904 = vmatmul.mubr.msk.f32.vlgmr.msra.gmra.mrb[16].mxu0 %vm793_vm2, %v2898_v54 }
 0xaf0   : > { %3134 = vmatpush3.bf16.msra.mxu0 %v3131_v48  ;;  %2925 = vmatprep.mubr.msk.f32.mxu0 %vm706_vm1, %v2137_v56 }
 0xaf1   : > { %3136 = vmatprep.subr.bf16.mxu0 %v3135_v8 }
 0xaf4   : > { %3138 = vmatpush3.bf16.msra.mxu0 %v3135_v8 }
 0xaf5   : > { %3140 = vmatprep.subr.bf16.mxu0 %v3139_v10 }
 0xaf7   : > { %2926 = vmatmul.mubr.msk.f32.vlgmr.msra.gmra.mrb[18].mxu0 %vm706_vm1, %v2138_v23 }
 0xaf8   : > { %3142 = vmatpush3.bf16.msra.mxu0 %v3139_v10 }
 0xbca   : > { %v2927_v32 = vpop.f32.mrb[18].mxu0 }
 0xbcb   : > { %v2223_v36 = vpop.f32.mrb[19].mxu0 }
 0xbcc   : > { %2932 = vmatprep.mubr.msk.f32.mxu0 %vm793_vm2, %v2223_v36 }
 0xbcd   : > { %2933 = vmatmul.mubr.msk.f32.vlgmr.msra.gmra.mrb[16].mxu0 %vm793_vm2, %v2927_v32 }
 0xca0   : > { %v2934_v42 = vpop.f32.mrb[16].mxu0 }
 0xca1   : > { %v2304_v58 = vpop.f32.mrb[17].mxu0  ;;  %v3145_v59 = vadd.f32 %v2934_v42, %v2519_v39 }
 0xca2   : > { %v3146_v12 = vadd.f32 %v2519_v39, %v2304_v58 }
 0xca4   : > { %2317 = vrot.lane.b32.xlu1 %v3146_v12, %s3489_s26 }
 0xca8   : > { %2319 = vrot.lane.b32.xlu1 %v3145_v59, %s3489_s26  ;;  %s3414_s26 = scalar_lea.vmem %s3413_s21, 512 }
 0xca9   : > { %p3416_p6 = scmp.lt.s32.totalorder %s3414_s26, %s3408_s20 }
 0xcab   : > { %p3417_p10 = por %p3416_p6, %p3415_p3 }
 0xcad   : > { %p3418_p2 = pnand %p3417_p10, %p3411_p1 }
 0xd16   : > { %v2318_v62 = vpop.permute.xlu1 %2317 }
 0xd17   : > { %v2323_v63 = vsel %vm595_vm0, %v3144_v61, %v2318_v62 }
 0xd18   : > { %2325 = vst [vmem:[%s448_s28] sm:$0xff] %v2323_v63 }
 0xd1a   : > { %v2320_v5 = vpop.permute.xlu1 %2319 }
 0xd1b   : > { %v2324_v1 = vsel %vm595_vm0, %v3143_v0, %v2320_v5 }
 0xd1c   : > { %2326 = vst [vmem:[%s448_s28 + $0x8] sm:$0xff] %v2324_v1 }
 0xd1d   : > { %3421 = shalt.err (!%p3418_p2)
}
 0xd1e   : > { %s3422_s27 = scalar_lea.hbm %s4060_s22, 256  ;;  %s3426_s28 = scalar_lea.hbm %s4151_s24, 512 }
 0xd1f   : > { %p3423_p5 = scmp.ne.s32.totalorder %s4060_s22, %s3422_s27  ;;  %p3427_p4 = scmp.lt.u32.totalorder %s4060_s22, %s4151_s24 }
 0xd20   : > { %p3428_p7 = scmp.lt.u32.totalorder %s3426_s28, %s3422_s27  ;;  %p3430_p13 = scmp.lt.u32.totalorder %s3422_s27, %s4060_s22 }
 0xd21   : > { %p3424_p12 = pnand %p3423_p5, %p4152_p9 }
 0xd22   : > { %p3429_p8 = por %p3428_p7, %p3427_p4 }
 0xd23   : > { %p3425_p0 = pneg %p3424_p12 }
 0xd24   : > { %p3431_p1 = por %p3430_p13, %p3429_p8 }
 0xd26   : > { %p3432_p3 = pnand %p3431_p1, %p3425_p0 }
 0xd28   : > { %3435 = shalt.err (!%p3432_p3)
}
 0xd29   : > { %s3491_s10 = smov 128   ;;  %s3492_s13 = smov 8  }
 0xd2a   : > { %3163 = dma.vmem_to_hbm [thread:$0]  (%p4152_p9), %s4054_s11, 256, %s4060_s22, %s2328_s17, %s3491_s10, %s3491_s10, %s3492_s13  }
 0xd2b PF: > { %s4153_s20 = sld [smem:[#allocation13_spill]]  ;;  %s4154_s29 = sld [smem:[#allocation17_spill]] }
 0xd31   : > { %s2356_s21 = sand.u32 1, %s4153_s20   ;;  %p4155_p6 = scmp.ne.s32.totalorder %s4154_s29, 0 }
 0xd32   : > { %s2357_s26 = scalar_lea.sflag [#allocation5], %s2356_s21 }
 0xd33   : > { %p3176_p10 = pnand %p2445_p11, %p4155_p6 }
 0xd35   : > { %3461 = dma.done.wait (!%p3176_p10), %s2357_s26, 256  }
 0xd36   : > { %3463 = vsyncadd (!%p3176_p10), %s2357_s26, 4294967040  ;;  %s4156_s16 = sld [smem:[#allocation14_spill]]  ;;  %s4157_s27 = sld [smem:[#allocation15_spill]] }
 0xd37   : > { %s4158_s13 = smov %s3470_s14  ;;  %s4159_s14 = smov %s3474_s15 }
 0xd3c   : > { %p22_p2 = scmp.ge.s32.totalorder %s4156_s16, 4   ;;  %s4160_s15 = smov %s4157_s27 }
 0xd3e   :  { %24 = sbr.rel (!%p22_p2) target bundleno = 8 (0x8), region = 160 }
 0xd45   :  { %2362 = vsyncpa [#allocation4], 1 }
 0xd46   :  { %2364 = vsyncpa [#allocation4 + $0x1], 1 }
 0xd47   :  { %2365 = vsyncpa [#allocation7], 1 }
 0xd48   :  { %2366 = vsyncpa [#allocation5], 1 }
 0xd49   :  { %2368 = vsyncpa [#allocation5 + $0x1], 1 }

</bundles_post_ra>
